<compile_context>
chip_gen: v7x
topology: tpu7x:2x2x1
jax: 0.10.0
libtpu: 0.0.40
codegen_flags: <defaults>
</compile_context>

<pallas_src>
import jax
import jax.numpy as jnp
from jax.experimental import pallas as pl
from jax.experimental.pallas import tpu as pltpu


HSZ = 50          # LSTM hidden size (from the module)
HEAD_H = 10       # head hidden size
NFEATURES = 32    # synthetic feature count (df-derived in the original script)

HP = 128          # padded hidden size: one full vreg lane-width per gate
GP = 4 * HP       # padded gate width: [i, f, o, g] blocks at 128-lane offsets
SUB = 8           # sublane tile height; batch is padded to a multiple of this

# PyTorch LSTMCell weight gate order is (i, f, g, o); padded layout is
# (i, f, o, g) so the three sigmoid gates are lane-contiguous.
GATE_ORDER = (0, 1, 3, 2)   # dst block -> src block


def _sigmoid(z):
    # Exact identity; one EUP tanh instead of exp + VPU divide.
    return 0.5 * jnp.tanh(0.5 * z) + 0.5


def rnn_kernel(x2d_ref, xlast_ref, wih_ref, whh_ref, b_ref,
               w1_ref, b1_ref, w2_ref, b2_ref, out_ref):
    # x2d_ref:   (T*BP, F)  time-major rows: row t*BP + b == x[b, t, :]
    #                        (padded batch rows are zero)
    # xlast_ref: (BP, 1)    x[:, -1, 0:1] residual (padded rows zero)
    # wih_ref:   (F, GP)    gate-padded W_ih^T   (padded columns zero)
    # whh_ref:   (HP, GP)   gate-padded W_hh^T   (padded rows/columns zero)
    # b_ref:     (1, GP)    b_ih + b_hh, gate-padded with zeros
    # w1_ref:    (HP, 10)   (padded rows zero), b1_ref: (1, 10)
    # w2_ref:    (10, 1),   b2_ref: (1, 1)
    # out_ref:   (BP, 1)
    BP = out_ref.shape[0]
    TB, _ = x2d_ref.shape
    T = TB // BP

    # Hoisted input projection: one well-shaped MXU matmul + bias, done once,
    # off the sequential critical path.
    gates_x = (jnp.dot(x2d_ref[...], wih_ref[...],
                       preferred_element_type=jnp.float32)
               + b_ref[...])                                  # (T*BP, GP)

    # Initial state (padded to HP lanes): hx = 0, cx = 0 with cx[:, 0] = 1.0.
    # Padded hidden lanes stay exactly 0: their gate pre-activations are 0, so
    # f=0.5 multiplies c_pad=0 and i*g has g=tanh(0)=0.
    h = jnp.zeros((BP, HP), jnp.float32)
    col = jax.lax.broadcasted_iota(jnp.int32, (BP, HP), 1)
    c = jnp.where(col == 0, 1.0, 0.0).astype(jnp.float32)

    # Fully unrolled recurrence (T static): one (BP,128)@(128,512) MXU matmul
    # + 2 EUP dispatches + VPU elementwise per step.  All slices are
    # (8,128)-tile aligned (BP = 8 sublanes, 128-lane gate blocks).
    for t in range(T):
        gates = (gates_x[t * BP:(t + 1) * BP, :]
                 + jnp.dot(h, whh_ref[...],
                           preferred_element_type=jnp.float32))
        sig = _sigmoid(gates[:, 0:3 * HP])         # i, f, o in one dispatch
        i_g = sig[:, 0 * HP:1 * HP]
        f_g = sig[:, 1 * HP:2 * HP]
        o_g = sig[:, 2 * HP:3 * HP]
        g_g = jnp.tanh(gates[:, 3 * HP:4 * HP])
        c = f_g * c + i_g * g_g
        h = o_g * jnp.tanh(c)

    # Head: Linear(50,10) -> ReLU -> Linear(10,1)  (weights padded to HP rows).
    h1 = jnp.maximum(
        jnp.dot(h, w1_ref[...], preferred_element_type=jnp.float32)
        + b1_ref[...], 0.0)
    y = jnp.dot(h1, w2_ref[...], preferred_element_type=jnp.float32) + b2_ref[...]

    # + x[-1, :, 0:1]   (last time step, first feature column)
    out_ref[...] = y + xlast_ref[...]


def init_params(key, nfeatures=NFEATURES, hsz=HSZ, head_h=HEAD_H):
    ks = jax.random.split(key, 8)
    k_lstm = 1.0 / jnp.sqrt(hsz)
    k_h1 = 1.0 / jnp.sqrt(hsz)
    k_h2 = 1.0 / jnp.sqrt(head_h)
    u = lambda k, shape, lim: jax.random.uniform(
        k, shape, jnp.float32, -lim, lim)
    return dict(
        w_ih=u(ks[0], (4 * hsz, nfeatures), k_lstm),
        w_hh=u(ks[1], (4 * hsz, hsz), k_lstm),
        b_ih=u(ks[2], (4 * hsz,), k_lstm),
        b_hh=u(ks[3], (4 * hsz,), k_lstm),
        w1=u(ks[4], (head_h, hsz), k_h1),
        b1=u(ks[5], (head_h,), k_h1),
        w2=u(ks[6], (1, head_h), k_h2),
        b2=u(ks[7], (1,), k_h2),
    )


def _pad_gates(w_t, hsz=HSZ, hp=HP):
    """(K, 4*hsz) in PyTorch (i,f,g,o) order -> (K, 4*hp) in padded (i,f,o,g)
    order; each gate block at a 128-lane offset, padded columns zero."""
    K = w_t.shape[0]
    out = jnp.zeros((K, 4 * hp), jnp.float32)
    for dst, src in enumerate(GATE_ORDER):
        out = out.at[:, dst * hp:dst * hp + hsz].set(
            w_t[:, src * hsz:(src + 1) * hsz].astype(jnp.float32))
    return out


def rnn_forward(x, params):
    """x: (B, T, F) float32 -> (B, 1) float32"""
    B, T, F = x.shape
    x = x.astype(jnp.float32)
    BP = ((B + SUB - 1) // SUB) * SUB              # sublane-aligned batch

    # Time-major, batch-padded slab for the hoisted projection; last-step
    # residual column.  Tiny one-time wrapper ops.
    x_tbf = jnp.transpose(x, (1, 0, 2))                          # (T, B, F)
    x_pad = jnp.zeros((T, BP, F), jnp.float32).at[:, :B, :].set(x_tbf)
    x2d = x_pad.reshape(T * BP, F)                               # (T*BP, F)
    xlast = jnp.zeros((BP, 1), jnp.float32).at[:B, :].set(x_tbf[-1, :, 0:1])

    # Gate-padded, pre-transposed weights (zero-filled padding).
    wih_t = _pad_gates(params["w_ih"].T)                         # (F, GP)
    whh_t = jnp.zeros((HP, GP), jnp.float32).at[:HSZ, :].set(
        _pad_gates(params["w_hh"].T))                            # (HP, GP)
    b = _pad_gates((params["b_ih"] + params["b_hh"]).reshape(1, -1))  # (1, GP)
    w1_t = jnp.zeros((HP, HEAD_H), jnp.float32).at[:HSZ, :].set(
        params["w1"].T.astype(jnp.float32))                      # (HP, 10)
    b1 = params["b1"].reshape(1, -1).astype(jnp.float32)         # (1, 10)
    w2_t = params["w2"].T.astype(jnp.float32)                    # (10, 1)
    b2 = params["b2"].reshape(1, -1).astype(jnp.float32)         # (1, 1)

    vmem = pl.BlockSpec(memory_space=pltpu.MemorySpace.VMEM)
    out = pl.pallas_call(
        rnn_kernel,
        out_shape=jax.ShapeDtypeStruct((BP, 1), jnp.float32),
        in_specs=[vmem] * 9,
        out_specs=vmem,
    )(x2d, xlast, wih_t, whh_t, b, w1_t, b1, w2_t, b2)
    return out[:B]


def rnn_forward_ref(x, params):
    """Pure-JAX reference (same math, unpadded, PyTorch gate order)."""
    B, T, F = x.shape
    H = HSZ
    x_tbf = jnp.transpose(x, (1, 0, 2))
    h = jnp.zeros((B, H), jnp.float32)
    c = jnp.zeros((B, H), jnp.float32).at[:, 0].set(1.0)
    for t in range(T):
        gates = (x_tbf[t] @ params["w_ih"].T + params["b_ih"]
                 + h @ params["w_hh"].T + params["b_hh"])
        i_g = jax.nn.sigmoid(gates[:, 0:H])
        f_g = jax.nn.sigmoid(gates[:, H:2 * H])
        g_g = jnp.tanh(gates[:, 2 * H:3 * H])
        o_g = jax.nn.sigmoid(gates[:, 3 * H:4 * H])
        c = f_g * c + i_g * g_g
        h = o_g * jnp.tanh(c)
    h1 = jnp.maximum(h @ params["w1"].T + params["b1"], 0.0)
    y = h1 @ params["w2"].T + params["b2"]
    return y + x_tbf[-1, :, 0:1]


if __name__ == "__main__":
    key = jax.random.PRNGKey(0)
    k_param, k_x = jax.random.split(key)

    B, T, F = 4, 8, NFEATURES
    x = jax.random.normal(k_x, (B, T, F), jnp.float32)
    params = init_params(k_param)

    out = jax.block_until_ready(rnn_forward(x, params))
    ref = jax.block_until_ready(rnn_forward_ref(x, params))
    assert out.shape == (B, 1)
    assert jnp.allclose(out, ref, atol=1e-4, rtol=1e-4)
    print("KERNEL_OK")
</pallas_src>

<mosaic_0001>
module attributes {stable_mosaic.version = 11 : i64} {
  func.func @rnn_kernel(%arg0: memref<64x32xf32, #tpu.memory_space<vmem>>, %arg1: memref<8x1xf32, #tpu.memory_space<vmem>>, %arg2: memref<32x512xf32, #tpu.memory_space<vmem>>, %arg3: memref<128x512xf32, #tpu.memory_space<vmem>>, %arg4: memref<1x512xf32, #tpu.memory_space<vmem>>, %arg5: memref<128x10xf32, #tpu.memory_space<vmem>>, %arg6: memref<1x10xf32, #tpu.memory_space<vmem>>, %arg7: memref<10x1xf32, #tpu.memory_space<vmem>>, %arg8: memref<1x1xf32, #tpu.memory_space<vmem>>, %arg9: memref<8x1xf32, #tpu.memory_space<vmem>>) attributes {dimension_semantics = [], scalar_prefetch = 0 : i64, scratch_operands = 0 : i64, tpu.core_type = #tpu.core_type<tc>} {
    %c0 = arith.constant 0 : index
    %c0_0 = arith.constant 0 : index
    %0 = vector.load %arg0[%c0, %c0_0] : memref<64x32xf32, #tpu.memory_space<vmem>>, vector<64x32xf32>
    %c0_1 = arith.constant 0 : index
    %c0_2 = arith.constant 0 : index
    %1 = vector.load %arg2[%c0_1, %c0_2] : memref<32x512xf32, #tpu.memory_space<vmem>>, vector<32x512xf32>
    %cst = arith.constant dense<0.000000e+00> : vector<64x512xf32>
    %2 = tpu.matmul %0, %1, %cst {dimension_numbers = #tpu.dot_dimension_numbers<[1], [0], [0], [1], [0, 0, 1, 1], [], []>} : vector<64x32xf32>, vector<32x512xf32>, vector<64x512xf32> -> vector<64x512xf32>
    %c0_3 = arith.constant 0 : index
    %c0_4 = arith.constant 0 : index
    %3 = vector.load %arg4[%c0_3, %c0_4] : memref<1x512xf32, #tpu.memory_space<vmem>>, vector<1x512xf32>
    %4 = vector.broadcast %3 : vector<1x512xf32> to vector<64x512xf32>
    %5 = arith.addf %2, %4 : vector<64x512xf32>
    %cst_5 = arith.constant 0.000000e+00 : f32
    %6 = vector.broadcast %cst_5 : f32 to vector<8x128xf32>
    %7 = tpu.iota {dimensions = array<i32: 1>} : vector<8x128xi32>
    %c0_i32 = arith.constant 0 : i32
    %8 = vector.broadcast %c0_i32 : i32 to vector<8x128xi32>
    %9 = arith.cmpi eq, %7, %8 : vector<8x128xi32>
    %cst_6 = arith.constant 1.000000e+00 : f32
    %cst_7 = arith.constant 0.000000e+00 : f32
    %10 = vector.broadcast %cst_6 : f32 to vector<8x128xf32>
    %11 = vector.broadcast %cst_7 : f32 to vector<8x128xf32>
    %12 = arith.select %9, %10, %11 : vector<8x128xi1>, vector<8x128xf32>
    %13 = vector.extract_strided_slice %5 {offsets = [0, 0], sizes = [8, 512], strides = [1, 1]} : vector<64x512xf32> to vector<8x512xf32>
    %c0_8 = arith.constant 0 : index
    %c0_9 = arith.constant 0 : index
    %14 = vector.load %arg3[%c0_8, %c0_9] : memref<128x512xf32, #tpu.memory_space<vmem>>, vector<128x512xf32>
    %cst_10 = arith.constant dense<0.000000e+00> : vector<8x512xf32>
    %15 = tpu.matmul %6, %14, %cst_10 {dimension_numbers = #tpu.dot_dimension_numbers<[1], [0], [0], [1], [0, 0, 1, 1], [], []>} : vector<8x128xf32>, vector<128x512xf32>, vector<8x512xf32> -> vector<8x512xf32>
    %16 = arith.addf %13, %15 : vector<8x512xf32>
    %17 = vector.extract_strided_slice %16 {offsets = [0, 0], sizes = [8, 384], strides = [1, 1]} : vector<8x512xf32> to vector<8x384xf32>
    %cst_11 = arith.constant 5.000000e-01 : f32
    %18 = vector.broadcast %cst_11 : f32 to vector<8x384xf32>
    %19 = arith.mulf %18, %17 : vector<8x384xf32>
    %20 = math.tanh %19 : vector<8x384xf32>
    %cst_12 = arith.constant 5.000000e-01 : f32
    %21 = vector.broadcast %cst_12 : f32 to vector<8x384xf32>
    %22 = arith.mulf %21, %20 : vector<8x384xf32>
    %cst_13 = arith.constant 5.000000e-01 : f32
    %23 = vector.broadcast %cst_13 : f32 to vector<8x384xf32>
    %24 = arith.addf %22, %23 : vector<8x384xf32>
    %25 = vector.extract_strided_slice %24 {offsets = [0, 0], sizes = [8, 128], strides = [1, 1]} : vector<8x384xf32> to vector<8x128xf32>
    %26 = vector.extract_strided_slice %24 {offsets = [0, 128], sizes = [8, 128], strides = [1, 1]} : vector<8x384xf32> to vector<8x128xf32>
    %27 = vector.extract_strided_slice %24 {offsets = [0, 256], sizes = [8, 128], strides = [1, 1]} : vector<8x384xf32> to vector<8x128xf32>
    %28 = vector.extract_strided_slice %16 {offsets = [0, 384], sizes = [8, 128], strides = [1, 1]} : vector<8x512xf32> to vector<8x128xf32>
    %29 = math.tanh %28 : vector<8x128xf32>
    %30 = arith.mulf %26, %12 : vector<8x128xf32>
    %31 = arith.mulf %25, %29 : vector<8x128xf32>
    %32 = arith.addf %30, %31 : vector<8x128xf32>
    %33 = math.tanh %32 : vector<8x128xf32>
    %34 = arith.mulf %27, %33 : vector<8x128xf32>
    %35 = vector.extract_strided_slice %5 {offsets = [8, 0], sizes = [8, 512], strides = [1, 1]} : vector<64x512xf32> to vector<8x512xf32>
    %c0_14 = arith.constant 0 : index
    %c0_15 = arith.constant 0 : index
    %36 = vector.load %arg3[%c0_14, %c0_15] : memref<128x512xf32, #tpu.memory_space<vmem>>, vector<128x512xf32>
    %cst_16 = arith.constant dense<0.000000e+00> : vector<8x512xf32>
    %37 = tpu.matmul %34, %36, %cst_16 {dimension_numbers = #tpu.dot_dimension_numbers<[1], [0], [0], [1], [0, 0, 1, 1], [], []>} : vector<8x128xf32>, vector<128x512xf32>, vector<8x512xf32> -> vector<8x512xf32>
    %38 = arith.addf %35, %37 : vector<8x512xf32>
    %39 = vector.extract_strided_slice %38 {offsets = [0, 0], sizes = [8, 384], strides = [1, 1]} : vector<8x512xf32> to vector<8x384xf32>
    %cst_17 = arith.constant 5.000000e-01 : f32
    %40 = vector.broadcast %cst_17 : f32 to vector<8x384xf32>
    %41 = arith.mulf %40, %39 : vector<8x384xf32>
    %42 = math.tanh %41 : vector<8x384xf32>
    %cst_18 = arith.constant 5.000000e-01 : f32
    %43 = vector.broadcast %cst_18 : f32 to vector<8x384xf32>
    %44 = arith.mulf %43, %42 : vector<8x384xf32>
    %cst_19 = arith.constant 5.000000e-01 : f32
    %45 = vector.broadcast %cst_19 : f32 to vector<8x384xf32>
    %46 = arith.addf %44, %45 : vector<8x384xf32>
    %47 = vector.extract_strided_slice %46 {offsets = [0, 0], sizes = [8, 128], strides = [1, 1]} : vector<8x384xf32> to vector<8x128xf32>
    %48 = vector.extract_strided_slice %46 {offsets = [0, 128], sizes = [8, 128], strides = [1, 1]} : vector<8x384xf32> to vector<8x128xf32>
    %49 = vector.extract_strided_slice %46 {offsets = [0, 256], sizes = [8, 128], strides = [1, 1]} : vector<8x384xf32> to vector<8x128xf32>
    %50 = vector.extract_strided_slice %38 {offsets = [0, 384], sizes = [8, 128], strides = [1, 1]} : vector<8x512xf32> to vector<8x128xf32>
    %51 = math.tanh %50 : vector<8x128xf32>
    %52 = arith.mulf %48, %32 : vector<8x128xf32>
    %53 = arith.mulf %47, %51 : vector<8x128xf32>
    %54 = arith.addf %52, %53 : vector<8x128xf32>
    %55 = math.tanh %54 : vector<8x128xf32>
    %56 = arith.mulf %49, %55 : vector<8x128xf32>
    %57 = vector.extract_strided_slice %5 {offsets = [16, 0], sizes = [8, 512], strides = [1, 1]} : vector<64x512xf32> to vector<8x512xf32>
    %c0_20 = arith.constant 0 : index
    %c0_21 = arith.constant 0 : index
    %58 = vector.load %arg3[%c0_20, %c0_21] : memref<128x512xf32, #tpu.memory_space<vmem>>, vector<128x512xf32>
    %cst_22 = arith.constant dense<0.000000e+00> : vector<8x512xf32>
    %59 = tpu.matmul %56, %58, %cst_22 {dimension_numbers = #tpu.dot_dimension_numbers<[1], [0], [0], [1], [0, 0, 1, 1], [], []>} : vector<8x128xf32>, vector<128x512xf32>, vector<8x512xf32> -> vector<8x512xf32>
    %60 = arith.addf %57, %59 : vector<8x512xf32>
    %61 = vector.extract_strided_slice %60 {offsets = [0, 0], sizes = [8, 384], strides = [1, 1]} : vector<8x512xf32> to vector<8x384xf32>
    %cst_23 = arith.constant 5.000000e-01 : f32
    %62 = vector.broadcast %cst_23 : f32 to vector<8x384xf32>
    %63 = arith.mulf %62, %61 : vector<8x384xf32>
    %64 = math.tanh %63 : vector<8x384xf32>
    %cst_24 = arith.constant 5.000000e-01 : f32
    %65 = vector.broadcast %cst_24 : f32 to vector<8x384xf32>
    %66 = arith.mulf %65, %64 : vector<8x384xf32>
    %cst_25 = arith.constant 5.000000e-01 : f32
    %67 = vector.broadcast %cst_25 : f32 to vector<8x384xf32>
    %68 = arith.addf %66, %67 : vector<8x384xf32>
    %69 = vector.extract_strided_slice %68 {offsets = [0, 0], sizes = [8, 128], strides = [1, 1]} : vector<8x384xf32> to vector<8x128xf32>
    %70 = vector.extract_strided_slice %68 {offsets = [0, 128], sizes = [8, 128], strides = [1, 1]} : vector<8x384xf32> to vector<8x128xf32>
    %71 = vector.extract_strided_slice %68 {offsets = [0, 256], sizes = [8, 128], strides = [1, 1]} : vector<8x384xf32> to vector<8x128xf32>
    %72 = vector.extract_strided_slice %60 {offsets = [0, 384], sizes = [8, 128], strides = [1, 1]} : vector<8x512xf32> to vector<8x128xf32>
    %73 = math.tanh %72 : vector<8x128xf32>
    %74 = arith.mulf %70, %54 : vector<8x128xf32>
    %75 = arith.mulf %69, %73 : vector<8x128xf32>
    %76 = arith.addf %74, %75 : vector<8x128xf32>
    %77 = math.tanh %76 : vector<8x128xf32>
    %78 = arith.mulf %71, %77 : vector<8x128xf32>
    %79 = vector.extract_strided_slice %5 {offsets = [24, 0], sizes = [8, 512], strides = [1, 1]} : vector<64x512xf32> to vector<8x512xf32>
    %c0_26 = arith.constant 0 : index
    %c0_27 = arith.constant 0 : index
    %80 = vector.load %arg3[%c0_26, %c0_27] : memref<128x512xf32, #tpu.memory_space<vmem>>, vector<128x512xf32>
    %cst_28 = arith.constant dense<0.000000e+00> : vector<8x512xf32>
    %81 = tpu.matmul %78, %80, %cst_28 {dimension_numbers = #tpu.dot_dimension_numbers<[1], [0], [0], [1], [0, 0, 1, 1], [], []>} : vector<8x128xf32>, vector<128x512xf32>, vector<8x512xf32> -> vector<8x512xf32>
    %82 = arith.addf %79, %81 : vector<8x512xf32>
    %83 = vector.extract_strided_slice %82 {offsets = [0, 0], sizes = [8, 384], strides = [1, 1]} : vector<8x512xf32> to vector<8x384xf32>
    %cst_29 = arith.constant 5.000000e-01 : f32
    %84 = vector.broadcast %cst_29 : f32 to vector<8x384xf32>
    %85 = arith.mulf %84, %83 : vector<8x384xf32>
    %86 = math.tanh %85 : vector<8x384xf32>
    %cst_30 = arith.constant 5.000000e-01 : f32
    %87 = vector.broadcast %cst_30 : f32 to vector<8x384xf32>
    %88 = arith.mulf %87, %86 : vector<8x384xf32>
    %cst_31 = arith.constant 5.000000e-01 : f32
    %89 = vector.broadcast %cst_31 : f32 to vector<8x384xf32>
    %90 = arith.addf %88, %89 : vector<8x384xf32>
    %91 = vector.extract_strided_slice %90 {offsets = [0, 0], sizes = [8, 128], strides = [1, 1]} : vector<8x384xf32> to vector<8x128xf32>
    %92 = vector.extract_strided_slice %90 {offsets = [0, 128], sizes = [8, 128], strides = [1, 1]} : vector<8x384xf32> to vector<8x128xf32>
    %93 = vector.extract_strided_slice %90 {offsets = [0, 256], sizes = [8, 128], strides = [1, 1]} : vector<8x384xf32> to vector<8x128xf32>
    %94 = vector.extract_strided_slice %82 {offsets = [0, 384], sizes = [8, 128], strides = [1, 1]} : vector<8x512xf32> to vector<8x128xf32>
    %95 = math.tanh %94 : vector<8x128xf32>
    %96 = arith.mulf %92, %76 : vector<8x128xf32>
    %97 = arith.mulf %91, %95 : vector<8x128xf32>
    %98 = arith.addf %96, %97 : vector<8x128xf32>
    %99 = math.tanh %98 : vector<8x128xf32>
    %100 = arith.mulf %93, %99 : vector<8x128xf32>
    %101 = vector.extract_strided_slice %5 {offsets = [32, 0], sizes = [8, 512], strides = [1, 1]} : vector<64x512xf32> to vector<8x512xf32>
    %c0_32 = arith.constant 0 : index
    %c0_33 = arith.constant 0 : index
    %102 = vector.load %arg3[%c0_32, %c0_33] : memref<128x512xf32, #tpu.memory_space<vmem>>, vector<128x512xf32>
    %cst_34 = arith.constant dense<0.000000e+00> : vector<8x512xf32>
    %103 = tpu.matmul %100, %102, %cst_34 {dimension_numbers = #tpu.dot_dimension_numbers<[1], [0], [0], [1], [0, 0, 1, 1], [], []>} : vector<8x128xf32>, vector<128x512xf32>, vector<8x512xf32> -> vector<8x512xf32>
    %104 = arith.addf %101, %103 : vector<8x512xf32>
    %105 = vector.extract_strided_slice %104 {offsets = [0, 0], sizes = [8, 384], strides = [1, 1]} : vector<8x512xf32> to vector<8x384xf32>
    %cst_35 = arith.constant 5.000000e-01 : f32
    %106 = vector.broadcast %cst_35 : f32 to vector<8x384xf32>
    %107 = arith.mulf %106, %105 : vector<8x384xf32>
    %108 = math.tanh %107 : vector<8x384xf32>
    %cst_36 = arith.constant 5.000000e-01 : f32
    %109 = vector.broadcast %cst_36 : f32 to vector<8x384xf32>
    %110 = arith.mulf %109, %108 : vector<8x384xf32>
    %cst_37 = arith.constant 5.000000e-01 : f32
    %111 = vector.broadcast %cst_37 : f32 to vector<8x384xf32>
    %112 = arith.addf %110, %111 : vector<8x384xf32>
    %113 = vector.extract_strided_slice %112 {offsets = [0, 0], sizes = [8, 128], strides = [1, 1]} : vector<8x384xf32> to vector<8x128xf32>
    %114 = vector.extract_strided_slice %112 {offsets = [0, 128], sizes = [8, 128], strides = [1, 1]} : vector<8x384xf32> to vector<8x128xf32>
    %115 = vector.extract_strided_slice %112 {offsets = [0, 256], sizes = [8, 128], strides = [1, 1]} : vector<8x384xf32> to vector<8x128xf32>
    %116 = vector.extract_strided_slice %104 {offsets = [0, 384], sizes = [8, 128], strides = [1, 1]} : vector<8x512xf32> to vector<8x128xf32>
    %117 = math.tanh %116 : vector<8x128xf32>
    %118 = arith.mulf %114, %98 : vector<8x128xf32>
    %119 = arith.mulf %113, %117 : vector<8x128xf32>
    %120 = arith.addf %118, %119 : vector<8x128xf32>
    %121 = math.tanh %120 : vector<8x128xf32>
    %122 = arith.mulf %115, %121 : vector<8x128xf32>
    %123 = vector.extract_strided_slice %5 {offsets = [40, 0], sizes = [8, 512], strides = [1, 1]} : vector<64x512xf32> to vector<8x512xf32>
    %c0_38 = arith.constant 0 : index
    %c0_39 = arith.constant 0 : index
    %124 = vector.load %arg3[%c0_38, %c0_39] : memref<128x512xf32, #tpu.memory_space<vmem>>, vector<128x512xf32>
    %cst_40 = arith.constant dense<0.000000e+00> : vector<8x512xf32>
    %125 = tpu.matmul %122, %124, %cst_40 {dimension_numbers = #tpu.dot_dimension_numbers<[1], [0], [0], [1], [0, 0, 1, 1], [], []>} : vector<8x128xf32>, vector<128x512xf32>, vector<8x512xf32> -> vector<8x512xf32>
    %126 = arith.addf %123, %125 : vector<8x512xf32>
    %127 = vector.extract_strided_slice %126 {offsets = [0, 0], sizes = [8, 384], strides = [1, 1]} : vector<8x512xf32> to vector<8x384xf32>
    %cst_41 = arith.constant 5.000000e-01 : f32
    %128 = vector.broadcast %cst_41 : f32 to vector<8x384xf32>
    %129 = arith.mulf %128, %127 : vector<8x384xf32>
    %130 = math.tanh %129 : vector<8x384xf32>
    %cst_42 = arith.constant 5.000000e-01 : f32
    %131 = vector.broadcast %cst_42 : f32 to vector<8x384xf32>
    %132 = arith.mulf %131, %130 : vector<8x384xf32>
    %cst_43 = arith.constant 5.000000e-01 : f32
    %133 = vector.broadcast %cst_43 : f32 to vector<8x384xf32>
    %134 = arith.addf %132, %133 : vector<8x384xf32>
    %135 = vector.extract_strided_slice %134 {offsets = [0, 0], sizes = [8, 128], strides = [1, 1]} : vector<8x384xf32> to vector<8x128xf32>
    %136 = vector.extract_strided_slice %134 {offsets = [0, 128], sizes = [8, 128], strides = [1, 1]} : vector<8x384xf32> to vector<8x128xf32>
    %137 = vector.extract_strided_slice %134 {offsets = [0, 256], sizes = [8, 128], strides = [1, 1]} : vector<8x384xf32> to vector<8x128xf32>
    %138 = vector.extract_strided_slice %126 {offsets = [0, 384], sizes = [8, 128], strides = [1, 1]} : vector<8x512xf32> to vector<8x128xf32>
    %139 = math.tanh %138 : vector<8x128xf32>
    %140 = arith.mulf %136, %120 : vector<8x128xf32>
    %141 = arith.mulf %135, %139 : vector<8x128xf32>
    %142 = arith.addf %140, %141 : vector<8x128xf32>
    %143 = math.tanh %142 : vector<8x128xf32>
    %144 = arith.mulf %137, %143 : vector<8x128xf32>
    %145 = vector.extract_strided_slice %5 {offsets = [48, 0], sizes = [8, 512], strides = [1, 1]} : vector<64x512xf32> to vector<8x512xf32>
    %c0_44 = arith.constant 0 : index
    %c0_45 = arith.constant 0 : index
    %146 = vector.load %arg3[%c0_44, %c0_45] : memref<128x512xf32, #tpu.memory_space<vmem>>, vector<128x512xf32>
    %cst_46 = arith.constant dense<0.000000e+00> : vector<8x512xf32>
    %147 = tpu.matmul %144, %146, %cst_46 {dimension_numbers = #tpu.dot_dimension_numbers<[1], [0], [0], [1], [0, 0, 1, 1], [], []>} : vector<8x128xf32>, vector<128x512xf32>, vector<8x512xf32> -> vector<8x512xf32>
    %148 = arith.addf %145, %147 : vector<8x512xf32>
    %149 = vector.extract_strided_slice %148 {offsets = [0, 0], sizes = [8, 384], strides = [1, 1]} : vector<8x512xf32> to vector<8x384xf32>
    %cst_47 = arith.constant 5.000000e-01 : f32
    %150 = vector.broadcast %cst_47 : f32 to vector<8x384xf32>
    %151 = arith.mulf %150, %149 : vector<8x384xf32>
    %152 = math.tanh %151 : vector<8x384xf32>
    %cst_48 = arith.constant 5.000000e-01 : f32
    %153 = vector.broadcast %cst_48 : f32 to vector<8x384xf32>
    %154 = arith.mulf %153, %152 : vector<8x384xf32>
    %cst_49 = arith.constant 5.000000e-01 : f32
    %155 = vector.broadcast %cst_49 : f32 to vector<8x384xf32>
    %156 = arith.addf %154, %155 : vector<8x384xf32>
    %157 = vector.extract_strided_slice %156 {offsets = [0, 0], sizes = [8, 128], strides = [1, 1]} : vector<8x384xf32> to vector<8x128xf32>
    %158 = vector.extract_strided_slice %156 {offsets = [0, 128], sizes = [8, 128], strides = [1, 1]} : vector<8x384xf32> to vector<8x128xf32>
    %159 = vector.extract_strided_slice %156 {offsets = [0, 256], sizes = [8, 128], strides = [1, 1]} : vector<8x384xf32> to vector<8x128xf32>
    %160 = vector.extract_strided_slice %148 {offsets = [0, 384], sizes = [8, 128], strides = [1, 1]} : vector<8x512xf32> to vector<8x128xf32>
    %161 = math.tanh %160 : vector<8x128xf32>
    %162 = arith.mulf %158, %142 : vector<8x128xf32>
    %163 = arith.mulf %157, %161 : vector<8x128xf32>
    %164 = arith.addf %162, %163 : vector<8x128xf32>
    %165 = math.tanh %164 : vector<8x128xf32>
    %166 = arith.mulf %159, %165 : vector<8x128xf32>
    %167 = vector.extract_strided_slice %5 {offsets = [56, 0], sizes = [8, 512], strides = [1, 1]} : vector<64x512xf32> to vector<8x512xf32>
    %c0_50 = arith.constant 0 : index
    %c0_51 = arith.constant 0 : index
    %168 = vector.load %arg3[%c0_50, %c0_51] : memref<128x512xf32, #tpu.memory_space<vmem>>, vector<128x512xf32>
    %cst_52 = arith.constant dense<0.000000e+00> : vector<8x512xf32>
    %169 = tpu.matmul %166, %168, %cst_52 {dimension_numbers = #tpu.dot_dimension_numbers<[1], [0], [0], [1], [0, 0, 1, 1], [], []>} : vector<8x128xf32>, vector<128x512xf32>, vector<8x512xf32> -> vector<8x512xf32>
    %170 = arith.addf %167, %169 : vector<8x512xf32>
    %171 = vector.extract_strided_slice %170 {offsets = [0, 0], sizes = [8, 384], strides = [1, 1]} : vector<8x512xf32> to vector<8x384xf32>
    %cst_53 = arith.constant 5.000000e-01 : f32
    %172 = vector.broadcast %cst_53 : f32 to vector<8x384xf32>
    %173 = arith.mulf %172, %171 : vector<8x384xf32>
    %174 = math.tanh %173 : vector<8x384xf32>
    %cst_54 = arith.constant 5.000000e-01 : f32
    %175 = vector.broadcast %cst_54 : f32 to vector<8x384xf32>
    %176 = arith.mulf %175, %174 : vector<8x384xf32>
    %cst_55 = arith.constant 5.000000e-01 : f32
    %177 = vector.broadcast %cst_55 : f32 to vector<8x384xf32>
    %178 = arith.addf %176, %177 : vector<8x384xf32>
    %179 = vector.extract_strided_slice %178 {offsets = [0, 0], sizes = [8, 128], strides = [1, 1]} : vector<8x384xf32> to vector<8x128xf32>
    %180 = vector.extract_strided_slice %178 {offsets = [0, 128], sizes = [8, 128], strides = [1, 1]} : vector<8x384xf32> to vector<8x128xf32>
    %181 = vector.extract_strided_slice %178 {offsets = [0, 256], sizes = [8, 128], strides = [1, 1]} : vector<8x384xf32> to vector<8x128xf32>
    %182 = vector.extract_strided_slice %170 {offsets = [0, 384], sizes = [8, 128], strides = [1, 1]} : vector<8x512xf32> to vector<8x128xf32>
    %183 = math.tanh %182 : vector<8x128xf32>
    %184 = arith.mulf %180, %164 : vector<8x128xf32>
    %185 = arith.mulf %179, %183 : vector<8x128xf32>
    %186 = arith.addf %184, %185 : vector<8x128xf32>
    %187 = math.tanh %186 : vector<8x128xf32>
    %188 = arith.mulf %181, %187 : vector<8x128xf32>
    %c0_56 = arith.constant 0 : index
    %c0_57 = arith.constant 0 : index
    %189 = vector.load %arg5[%c0_56, %c0_57] : memref<128x10xf32, #tpu.memory_space<vmem>>, vector<128x10xf32>
    %cst_58 = arith.constant dense<0.000000e+00> : vector<8x10xf32>
    %190 = tpu.matmul %188, %189, %cst_58 {dimension_numbers = #tpu.dot_dimension_numbers<[1], [0], [0], [1], [0, 0, 1, 1], [], []>} : vector<8x128xf32>, vector<128x10xf32>, vector<8x10xf32> -> vector<8x10xf32>
    %c0_59 = arith.constant 0 : index
    %c0_60 = arith.constant 0 : index
    %191 = vector.load %arg6[%c0_59, %c0_60] : memref<1x10xf32, #tpu.memory_space<vmem>>, vector<1x10xf32>
    %192 = vector.broadcast %191 : vector<1x10xf32> to vector<8x10xf32>
    %193 = arith.addf %190, %192 : vector<8x10xf32>
    %cst_61 = arith.constant 0.000000e+00 : f32
    %194 = vector.broadcast %cst_61 : f32 to vector<8x10xf32>
    %195 = arith.maximumf %193, %194 : vector<8x10xf32>
    %c0_62 = arith.constant 0 : index
    %c0_63 = arith.constant 0 : index
    %196 = vector.load %arg7[%c0_62, %c0_63] : memref<10x1xf32, #tpu.memory_space<vmem>>, vector<10x1xf32>
    %cst_64 = arith.constant dense<0.000000e+00> : vector<8x1xf32>
    %197 = tpu.matmul %195, %196, %cst_64 {dimension_numbers = #tpu.dot_dimension_numbers<[1], [0], [0], [1], [0, 0, 1, 1], [], []>} : vector<8x10xf32>, vector<10x1xf32>, vector<8x1xf32> -> vector<8x1xf32>
    %c0_65 = arith.constant 0 : index
    %c0_66 = arith.constant 0 : index
    %198 = vector.load %arg8[%c0_65, %c0_66] : memref<1x1xf32, #tpu.memory_space<vmem>>, vector<1x1xf32>
    %199 = vector.broadcast %198 : vector<1x1xf32> to vector<8x1xf32>
    %200 = arith.addf %197, %199 : vector<8x1xf32>
    %c0_67 = arith.constant 0 : index
    %c0_68 = arith.constant 0 : index
    %201 = vector.load %arg1[%c0_67, %c0_68] : memref<8x1xf32, #tpu.memory_space<vmem>>, vector<8x1xf32>
    %202 = arith.addf %200, %201 : vector<8x1xf32>
    %c0_69 = arith.constant 0 : index
    %c0_70 = arith.constant 0 : index
    %203 = vector.load %arg9[%c0_69, %c0_70] : memref<8x1xf32, #tpu.memory_space<vmem>>, vector<8x1xf32>
    tpu.vector_store %arg9[%c0_69, %c0_70], %202 {strides = array<i32>} : memref<8x1xf32, #tpu.memory_space<vmem>>, vector<8x1xf32>,
    return
  }
}

</mosaic_0001>

<bundles_post_ra>
// kernel: tpu_custom_call.1
= control target key start
LH: loop header
LB: loop body
LE: loop exit
PB: predicated region body
PF: predicated region fallthrough
CT: control target
= control target key end

     0   :  { %s3379_s0 = inlined_call_operand.vmem [shape: f32[64,32], index: 0, kind: input, shape index: {}]   ;;  %s3380_s1 = inlined_call_operand.vmem [shape: f32[8,1], index: 1, kind: input, shape index: {}]   ;;  %s3381_s2 = inlined_call_operand.vmem [shape: f32[32,512], index: 2, kind: input, shape index: {}]   ;;  %s3382_s3 = inlined_call_operand.hbm [shape: f32[128,512], index: 3, kind: input, shape index: {}]   ;;  %s3383_s4 = inlined_call_operand.vmem [shape: f32[1,512], index: 4, kind: input, shape index: {}]   ;;  %s3384_s5 = inlined_call_operand.vmem [shape: f32[128,10], index: 5, kind: input, shape index: {}]   ;;  %s3385_s6 = inlined_call_operand.vmem [shape: f32[1,10], index: 6, kind: input, shape index: {}]   ;;  %s3386_s7 = inlined_call_operand.vmem [shape: f32[10,1], index: 7, kind: input, shape index: {}]   ;;  %s3387_s8 = inlined_call_operand.<no memory space> [shape: f32[1,1], index: 8, kind: input, shape index: {}]   ;;  %s3388_s9 = inlined_call_operand.vmem [shape: f32[8,1], index: 9, kind: output, shape index: {}]  }
   0x1   :  { %v14_v0 = vstv %s3387_s8 }
   0x2   :  { %15 = vst [vmem:[#allocation2] sm:$0x1] %v14_v0 }
   0x3   :  { %16 = vsyncpa [#allocation4], 0  ;;  %s2728_s11 = smov [#allocation3]   ;;  %s2704_s15 = scalar_lea.hbm %s3382_s3, 8192 }
   0x4   :  { %s28_s12 = sshll.u32 %s2728_s11, 4  ;;  %p2705_p0 = scmp.ne.s32.totalorder %s3382_s3, %s2704_s15  ;;  %s29_s12 = int_to_ptr.vmem [resolvable:$true] %s28_s12 }
   0x5   :  { %p2708_p1 = scmp.lt.u32.totalorder %s2704_s15, %s3382_s3 }
   0x7   :  { %p2710_p2 = pnand %p2708_p1, %p2705_p0 }
   0x9   :  { %2713 = shalt.err (!%p2710_p2)
}
   0xa   :  { %s2714_s8 = scalar_lea.vmem %s29_s12, 8192  ;;  %p2719_p4 = scmp.lt.s32.totalorder %s29_s12, %s29_s12 }
   0xb   :  { %p2715_p3 = scmp.ne.s32.totalorder %s29_s12, %s2714_s8  ;;  %p2720_p5 = scmp.lt.s32.totalorder %s2714_s8, %s2714_s8 }
   0xd   :  { %p2721_p6 = por %p2720_p5, %p2719_p4 }
   0xf   :  { %p2722_p7 = pnand %p2721_p6, %p2715_p3 }
  0x11   :  { %2725 = shalt.err (!%p2722_p7)
}
  0x12   :  { %s2729_s20 = smov 512   ;;  %s2730_s21 = smov 32  }
  0x13   :  { %34 = dma.hbm_to_vmem [thread:$0]  %s3382_s3, 8192, %s29_s12, [#allocation4], %s2729_s20, %s2729_s20, %s2730_s21  }
  0x14   :  { %2726 = dma.done.wait [#allocation4], 8192  }
  0x15   :  { %2727 = vsyncadd [#allocation4], 4294959104  ;;  %v2731_v1 = vmov 0.0   ;;  %v57_v2 = vld [vmem:[%s3381_s2 + $0x8] sm:$0xff]  ;;  %v59_v4 = vld [vmem:[%s3381_s2 + $0x18] sm:$0xff]  ;;  %vm94_vm0 = vcmask 261120  }
  0x16   :  { %183 = vmatprep.mubr.f32.mxu0 %v2731_v1  ;;  %296 = vmatprep.mubr.f32.mxu1 %v2731_v1  ;;  %v61_v3 = vld [vmem:[%s3381_s2 + $0x28] sm:$0xff]  ;;  %v63_v6 = vld [vmem:[%s3381_s2 + $0x38] sm:$0xff]  ;;  %v56_v7 = vld [vmem:[%s3381_s2] sm:$0xff]  ;;  %vm2733_vm2 = vmmov 0   ;;  %vm1832_vm3 = vcmask 1041408   ;;  %vm2734_vm4 = vmmov 1  }
  0x17   :  { %v1997_v5 = vpack.c.bf16 %v61_v3, %v57_v2  ;;  %v60_v8 = vld [vmem:[%s3381_s2 + $0x20] sm:$0xff]  ;;  %v2005_v9 = vpack.c.bf16 %v63_v6, %v59_v4  ;;  %v58_v11 = vld [vmem:[%s3381_s2 + $0x10] sm:$0xff]  ;;  %v65_v13 = vld [vmem:[%s3381_s2 + $0x48] sm:$0xff]  ;;  %vm1828_vm6 = vcmask 80896   ;;  %vm1908_vm7 = vcmask 7168  }
  0x18   :  { %v1999_v10 = vpack.c.bf16 %v60_v8, %v56_v7  ;;  %v62_v12 = vld [vmem:[%s3381_s2 + $0x30] sm:$0xff]  ;;  %v69_v15 = vld [vmem:[%s3381_s2 + $0x68] sm:$0xff]  ;;  %v67_v16 = vld [vmem:[%s3381_s2 + $0x58] sm:$0xff] }
  0x19   :  { %1998 = vmatprep.subr.bf16.mxu0 %v1997_v5  ;;  %v2007_v14 = vpack.c.bf16 %v62_v12, %v58_v11  ;;  %v71_v17 = vld [vmem:[%s3381_s2 + $0x78] sm:$0xff]  ;;  %2006 = vmatprep.subr.bf16.mxu1 %v2005_v9  ;;  %v2001_v18 = vpack.c.bf16 %v69_v15, %v65_v13  ;;  %v64_v20 = vld [vmem:[%s3381_s2 + $0x40] sm:$0xff]  ;;  %v66_v22 = vld [vmem:[%s3381_s2 + $0x50] sm:$0xff] }
  0x1a   :  { %2000 = vmatpush1.bf16.msra.mxu0 %v1999_v10  ;;  %v2009_v19 = vpack.c.bf16 %v71_v17, %v67_v16  ;;  %v68_v21 = vld [vmem:[%s3381_s2 + $0x60] sm:$0xff]  ;;  %v70_v24 = vld [vmem:[%s3381_s2 + $0x70] sm:$0xff]  ;;  %v49_v47 = vld [vmem:[%s3379_s0 + $0x8] sm:$0xff] }
  0x1b   :  { %2008 = vmatpush1.bf16.msra.mxu1 %v2007_v14  ;;  %v2003_v23 = vpack.c.bf16 %v68_v21, %v64_v20  ;;  %v350_v25 = vld [vmem:[#allocation3 + $0x8] sm:$0xff]  ;;  %2002 = vmatprep.subr.bf16.mxu0 %v2001_v18  ;;  %v2011_v26 = vpack.c.bf16 %v70_v24, %v66_v22  ;;  %v352_v28 = vld [vmem:[#allocation3 + $0x18] sm:$0xff]  ;;  %v349_v32 = vld [vmem:[#allocation3] sm:$0xff] }
  0x1c   :  { %2010 = vmatprep.subr.bf16.mxu1 %v2009_v19  ;;  %v354_v27 = vld [vmem:[#allocation3 + $0x28] sm:$0xff]  ;;  %v356_v29 = vld [vmem:[#allocation3 + $0x38] sm:$0xff]  ;;  %v353_v33 = vld [vmem:[#allocation3 + $0x20] sm:$0xff] }
  0x1d   :  { %v2850_v30 = vpack.c.bf16 %v354_v27, %v350_v25  ;;  %v2852_v31 = vpack.c.bf16 %v356_v29, %v352_v28  ;;  %v351_v34 = vld [vmem:[#allocation3 + $0x10] sm:$0xff]  ;;  %v48_v35 = vld [vmem:[%s3379_s0] sm:$0xff]  ;;  %v2857_v36 = vpack.c.bf16 %v353_v33, %v349_v32  ;;  %v358_v38 = vld [vmem:[#allocation3 + $0x48] sm:$0xff] }
  0x1e   :  { %2004 = vmatpush1.bf16.msra.mxu0 %v2003_v23  ;;  %v355_v37 = vld [vmem:[#allocation3 + $0x30] sm:$0xff]  ;;  %v362_v40 = vld [vmem:[#allocation3 + $0x68] sm:$0xff]  ;;  %v360_v41 = vld [vmem:[#allocation3 + $0x58] sm:$0xff] }
  0x1f   :  { %2012 = vmatpush1.bf16.msra.mxu1 %v2011_v26  ;;  %2014 = vmatprep.subr.bf16.mxu0 %v2850_v30  ;;  %v2860_v39 = vpack.c.bf16 %v355_v37, %v351_v34  ;;  %v364_v42 = vld [vmem:[#allocation3 + $0x78] sm:$0xff]  ;;  %v2863_v43 = vpack.c.bf16 %v362_v40, %v358_v38  ;;  %v357_v44 = vld [vmem:[#allocation3 + $0x40] sm:$0xff]  ;;  %v359_v46 = vld [vmem:[#allocation3 + $0x50] sm:$0xff] }
  0x20   :  { %2046 = vmatprep.subr.bf16.mxu1 %v2852_v31  ;;  %v361_v45 = vld [vmem:[#allocation3 + $0x60] sm:$0xff]  ;;  %v2869_v48 = vpack.c.bf16 %v364_v42, %v360_v41  ;;  %v363_v49 = vld [vmem:[#allocation3 + $0x70] sm:$0xff]  ;;  %v366_v50 = vld [vmem:[#allocation3 + $0x88] sm:$0xff] }
  0x21   :  { %1915 = vmatmul.mubr.msk.f32.vlgmr.msra.gmra.mrb[0].mxu0 %vm94_vm0, %v48_v35  ;;  %v2873_v51 = vpack.c.bf16 %v361_v45, %v357_v44  ;;  %v370_v52 = vld [vmem:[#allocation3 + $0xa8] sm:$0xff]  ;;  %v368_v53 = vld [vmem:[#allocation3 + $0x98] sm:$0xff]  ;;  %v2877_v55 = vpack.c.bf16 %v363_v49, %v359_v46  ;;  %v365_v56 = vld [vmem:[#allocation3 + $0x80] sm:$0xff] }
  0x22   :  { %1923 = vmatmul.mubr.msk.f32.vlgmr.msra.gmra.mrb[0].mxu1 %vm94_vm0, %v48_v35  ;;  %2016 = vmatpush1.bf16.msra.mxu0 %v2857_v36  ;;  %v372_v54 = vld [vmem:[#allocation3 + $0xb8] sm:$0xff]  ;;  %v369_v57 = vld [vmem:[#allocation3 + $0xa0] sm:$0xff]  ;;  %v2881_v58 = vpack.c.bf16 %v370_v52, %v366_v50  ;;  %v367_v59 = vld [vmem:[#allocation3 + $0x90] sm:$0xff] }
  0x23   :  { %2048 = vmatpush1.bf16.msra.mxu1 %v2860_v39  ;;  %189 = vmatprep.mubr.f32.mxu0 %v2731_v1  ;;  %v371_v60 = vld [vmem:[#allocation3 + $0xb0] sm:$0xff]  ;;  %v2885_v61 = vpack.c.bf16 %v372_v54, %v368_v53  ;;  %v374_v62 = vld [vmem:[#allocation3 + $0xc8] sm:$0xff]  ;;  %v2892_v2 = vpack.c.bf16 %v369_v57, %v365_v56  ;;  %v376_v3 = vld [vmem:[#allocation3 + $0xd8] sm:$0xff] }
  0x24   :  { %302 = vmatprep.mubr.f32.mxu1 %v2731_v1  ;;  %2018 = vmatprep.subr.bf16.mxu0 %v2863_v43  ;;  %v378_v63 = vld [vmem:[#allocation3 + $0xe8] sm:$0xff]  ;;  %v380_v4 = vld [vmem:[#allocation3 + $0xf8] sm:$0xff]  ;;  %v2896_v5 = vpack.c.bf16 %v371_v60, %v367_v59  ;;  %v373_v6 = vld [vmem:[#allocation3 + $0xc0] sm:$0xff] }
  0x25   :  { %1916 = vmatmul.mubr.msk.f32.gmra.mrb[2].mxu0 %vm94_vm0, %v49_v47  ;;  %2050 = vmatprep.subr.bf16.mxu1 %v2869_v48  ;;  %v50_v0 = vld [vmem:[%s3379_s0 + $0x10] sm:$0xff]  ;;  %v377_v7 = vld [vmem:[#allocation3 + $0xe0] sm:$0xff]  ;;  %v2900_v8 = vpack.c.bf16 %v378_v63, %v374_v62  ;;  %v2904_v11 = vpack.c.bf16 %v380_v4, %v376_v3  ;;  %v51_v14 = vld [vmem:[%s3379_s0 + $0x18] sm:$0xff] }
  0x26   :  { %1924 = vmatmul.mubr.msk.f32.gmra.mrb[2].mxu1 %vm94_vm0, %v49_v47  ;;  %2020 = vmatpush1.bf16.msra.mxu0 %v2873_v51  ;;  %v375_v9 = vld [vmem:[#allocation3 + $0xd0] sm:$0xff]  ;;  %v382_v12 = vld [vmem:[#allocation3 + $0x108] sm:$0xff]  ;;  %v2911_v15 = vpack.c.bf16 %v377_v7, %v373_v6  ;;  %v384_v16 = vld [vmem:[#allocation3 + $0x118] sm:$0xff] }
  0x27   :  { %2052 = vmatpush1.bf16.msra.mxu1 %v2877_v55  ;;  %195 = vmatprep.mubr.f32.mxu0 %v2731_v1  ;;  %v379_v10 = vld [vmem:[#allocation3 + $0xf0] sm:$0xff]  ;;  %v386_v13 = vld [vmem:[#allocation3 + $0x128] sm:$0xff]  ;;  %v388_v17 = vld [vmem:[#allocation3 + $0x138] sm:$0xff] }
  0x28   :  { %308 = vmatprep.mubr.f32.mxu1 %v2731_v1  ;;  %2022 = vmatprep.subr.bf16.mxu0 %v2881_v58  ;;  %v2915_v18 = vpack.c.bf16 %v379_v10, %v375_v9  ;;  %v381_v19 = vld [vmem:[#allocation3 + $0x100] sm:$0xff]  ;;  %v2919_v21 = vpack.c.bf16 %v386_v13, %v382_v12  ;;  %v383_v22 = vld [vmem:[#allocation3 + $0x110] sm:$0xff]  ;;  %v2923_v24 = vpack.c.bf16 %v388_v17, %v384_v16  ;;  %v390_v25 = vld [vmem:[#allocation3 + $0x148] sm:$0xff] }
  0x29   :  { %1917 = vmatmul.mubr.msk.f32.gmra.mrb[4].mxu0 %vm94_vm0, %v50_v0  ;;  %2054 = vmatprep.subr.bf16.mxu1 %v2885_v61  ;;  %v385_v20 = vld [vmem:[#allocation3 + $0x120] sm:$0xff]  ;;  %v387_v23 = vld [vmem:[#allocation3 + $0x130] sm:$0xff]  ;;  %v394_v26 = vld [vmem:[#allocation3 + $0x168] sm:$0xff] }
  0x2a   :  { %1925 = vmatmul.mubr.msk.f32.gmra.mrb[4].mxu1 %vm94_vm0, %v50_v0  ;;  %2024 = vmatpush1.bf16.msra.mxu0 %v2892_v2  ;;  %v52_v27 = vld [vmem:[%s3379_s0 + $0x20] sm:$0xff]  ;;  %v2930_v28 = vpack.c.bf16 %v385_v20, %v381_v19  ;;  %v2934_v33 = vpack.c.bf16 %v387_v23, %v383_v22  ;;  %v2938_v37 = vpack.c.bf16 %v394_v26, %v390_v25  ;;  %v391_v38 = vld [vmem:[#allocation3 + $0x150] sm:$0xff]  ;;  %v398_v42 = vld [vmem:[#allocation3 + $0x188] sm:$0xff]  ;;  %v74_v20 = vlaneseq }
  0x2b   :  { %2056 = vmatpush1.bf16.msra.mxu1 %v2896_v5  ;;  %201 = vmatprep.mubr.f32.mxu0 %v2731_v1  ;;  %v392_v29 = vld [vmem:[#allocation3 + $0x158] sm:$0xff]  ;;  %v389_v34 = vld [vmem:[#allocation3 + $0x140] sm:$0xff]  ;;  %v395_v40 = vld [vmem:[#allocation3 + $0x170] sm:$0xff] }
  0x2c   :  { %314 = vmatprep.mubr.f32.mxu1 %v2731_v1  ;;  %2026 = vmatprep.subr.bf16.mxu0 %v2900_v8  ;;  %v396_v32 = vld [vmem:[#allocation3 + $0x178] sm:$0xff]  ;;  %v393_v35 = vld [vmem:[#allocation3 + $0x160] sm:$0xff]  ;;  %v402_v44 = vld [vmem:[#allocation3 + $0x1a8] sm:$0xff]  ;;  %v2953_v50 = vpack.c.bf16 %v395_v40, %v391_v38  ;;  %v75_v22 = vshrl.u32 %v74_v20, 7 }
  0x2d   :  { %1918 = vmatmul.mubr.msk.f32.gmra.mrb[6].mxu0 %vm94_vm0, %v51_v14  ;;  %2058 = vmatprep.subr.bf16.mxu1 %v2904_v11  ;;  %v2942_v41 = vpack.c.bf16 %v396_v32, %v392_v29  ;;  %v53_v45 = vld [vmem:[%s3379_s0 + $0x28] sm:$0xff]  ;;  %v2949_v46 = vpack.c.bf16 %v393_v35, %v389_v34  ;;  %v400_v47 = vld [vmem:[#allocation3 + $0x198] sm:$0xff]  ;;  %v2957_v54 = vpack.c.bf16 %v402_v44, %v398_v42  ;;  %v399_v56 = vld [vmem:[#allocation3 + $0x190] sm:$0xff] }
  0x2e   :  { %1926 = vmatmul.mubr.msk.f32.gmra.mrb[6].mxu1 %vm94_vm0, %v51_v14  ;;  %2028 = vmatpush1.bf16.msra.mxu0 %v2911_v15  ;;  %v404_v49 = vld [vmem:[#allocation3 + $0x1b8] sm:$0xff]  ;;  %v397_v52 = vld [vmem:[#allocation3 + $0x180] sm:$0xff]  ;;  %v403_v57 = vld [vmem:[#allocation3 + $0x1b0] sm:$0xff]  ;;  %v76_v23 = vsub.s32 0, %v75_v22  ;;  %v80_v26 = vsub.s32 1, %v75_v22  ;;  %v88_v29 = vsub.s32 3, %v75_v22 }
  0x2f   :  { %2060 = vmatpush1.bf16.msra.mxu1 %v2915_v18  ;;  %207 = vmatprep.mubr.f32.mxu0 %v2731_v1  ;;  %v401_v53 = vld [vmem:[#allocation3 + $0x1a0] sm:$0xff]  ;;  %v2961_v59 = vpack.c.bf16 %v404_v49, %v400_v47  ;;  %v406_v60 = vld [vmem:[#allocation3 + $0x1c8] sm:$0xff]  ;;  %v408_v3 = vld [vmem:[#allocation3 + $0x1d8] sm:$0xff]  ;;  %v2972_v6 = vpack.c.bf16 %v403_v57, %v399_v56  ;;  %v84_v44 = vsub.s32 2, %v75_v22 }
  0x30   :  { %320 = vmatprep.mubr.f32.mxu1 %v2731_v1  ;;  %2030 = vmatprep.subr.bf16.mxu0 %v2919_v21  ;;  %v410_v62 = vld [vmem:[#allocation3 + $0x1e8] sm:$0xff]  ;;  %v2968_v0 = vpack.c.bf16 %v401_v53, %v397_v52  ;;  %v412_v4 = vld [vmem:[#allocation3 + $0x1f8] sm:$0xff]  ;;  %v405_v7 = vld [vmem:[#allocation3 + $0x1c0] sm:$0xff] }
  0x31   :  { %1919 = vmatmul.mubr.msk.f32.gmra.mrb[8].mxu0 %vm94_vm0, %v52_v27  ;;  %2062 = vmatprep.subr.bf16.mxu1 %v2923_v24  ;;  %v54_v63 = vld [vmem:[%s3379_s0 + $0x30] sm:$0xff]  ;;  %v409_v9 = vld [vmem:[#allocation3 + $0x1e0] sm:$0xff]  ;;  %v2976_v10 = vpack.c.bf16 %v410_v62, %v406_v60  ;;  %v2980_v14 = vpack.c.bf16 %v412_v4, %v408_v3  ;;  %v55_v16 = vld [vmem:[%s3379_s0 + $0x38] sm:$0xff]  ;;  %v346_v60 = vand.u32 127, %v74_v20 }
  0x32   :  { %1927 = vmatmul.mubr.msk.f32.gmra.mrb[8].mxu1 %vm94_vm0, %v52_v27  ;;  %2032 = vmatpush1.bf16.msra.mxu0 %v2930_v28  ;;  %v407_v12 = vld [vmem:[#allocation3 + $0x1d0] sm:$0xff]  ;;  %v2987_v17 = vpack.c.bf16 %v409_v9, %v405_v7  ;;  %v72_v25 = vld [vmem:[%s3383_s4] sm:$0xf]  ;;  %vm2551_vm5 = vmpackc.low %vm1832_vm3, %vm2734_vm4 }
  0x33   :  { %2064 = vmatpush1.bf16.msra.mxu1 %v2934_v33  ;;  %213 = vmatprep.mubr.f32.mxu0 %v2731_v1  ;;  %v411_v13 = vld [vmem:[#allocation3 + $0x1f0] sm:$0xff]  ;;  %v3043_v27 = vrot.slane %v72_v25, %v76_v23  ;;  %v3045_v32 = vrot.slane %v72_v25, %v80_v26  ;;  %v3048_v42 = vrot.slane %v72_v25, %v88_v29  ;;  %vm347_vm1 = vcmp.eq.s32.totalorder %v346_v60, 0 }
  0x34   :  { %326 = vmatprep.mubr.f32.mxu1 %v2731_v1  ;;  %2034 = vmatprep.subr.bf16.mxu0 %v2938_v37  ;;  %v2991_v19 = vpack.c.bf16 %v411_v13, %v407_v12  ;;  %v3052_v56 = vrot.slane %v72_v25, %v84_v44  ;;  %v348_v13 = vsel %vm347_vm1, 1.0, %v2731_v1 }
  0x35   :  { %1920 = vmatmul.mubr.msk.f32.gmra.mrb[10].mxu0 %vm94_vm0, %v53_v45  ;;  %2066 = vmatprep.subr.bf16.mxu1 %v2942_v41 }
  0x36   :  { %1928 = vmatmul.mubr.msk.f32.gmra.mrb[10].mxu1 %vm94_vm0, %v53_v45  ;;  %2036 = vmatpush1.bf16.msra.mxu0 %v2949_v46 }
  0x37   :  { %2068 = vmatpush1.bf16.msra.mxu1 %v2953_v50  ;;  %219 = vmatprep.mubr.f32.mxu0 %v2731_v1 }
  0x38   :  { %332 = vmatprep.mubr.f32.mxu1 %v2731_v1  ;;  %2038 = vmatprep.subr.bf16.mxu0 %v2957_v54 }
  0x39   :  { %1921 = vmatmul.mubr.msk.f32.gmra.mrb[12].mxu0 %vm94_vm0, %v54_v63  ;;  %2070 = vmatprep.subr.bf16.mxu1 %v2961_v59 }
  0x3a   :  { %1929 = vmatmul.mubr.msk.f32.gmra.mrb[12].mxu1 %vm94_vm0, %v54_v63  ;;  %2040 = vmatpush1.bf16.msra.mxu0 %v2968_v0 }
  0x3b   :  { %2072 = vmatpush1.bf16.msra.mxu1 %v2972_v6  ;;  %225 = vmatprep.mubr.f32.mxu0 %v2731_v1 }
  0x3c   :  { %338 = vmatprep.mubr.f32.mxu1 %v2731_v1  ;;  %2042 = vmatprep.subr.bf16.mxu0 %v2976_v10 }
  0x3d   :  { %1922 = vmatmul.mubr.msk.f32.gmra.mrb[14].mxu0 %vm94_vm0, %v55_v16  ;;  %2074 = vmatprep.subr.bf16.mxu1 %v2980_v14 }
  0x3e   :  { %1930 = vmatmul.mubr.msk.f32.gmra.mrb[14].mxu1 %vm94_vm0, %v55_v16  ;;  %2044 = vmatpush1.bf16.msra.mxu0 %v2987_v17 }
  0x3f   :  { %2076 = vmatpush1.bf16.msra.mxu1 %v2991_v19  ;;  %477 = vmatprep.mubr.f32.mxu0 %v2731_v1 }
  0x40   :  { %548 = vmatprep.mubr.f32.mxu1 %v2731_v1  ;;  %2078 = vmatprep.subr.bf16.mxu0 %v2850_v30 }
  0x41   :  { %478 = vmatmul.mubr.f32.vlgmr.msra.gmra.mrb[0].mxu0 %v2731_v1  ;;  %2110 = vmatprep.subr.bf16.mxu1 %v2852_v31 }
  0x42   :  { %549 = vmatmul.mubr.f32.vlgmr.msra.gmra.mrb[0].mxu1 %v2731_v1  ;;  %2080 = vmatpush1.bf16.msra.mxu0 %v2857_v36 }
  0x43   :  { %2112 = vmatpush1.bf16.msra.mxu1 %v2860_v39  ;;  %2082 = vmatprep.subr.bf16.mxu0 %v2863_v43 }
  0x44   :  { %2114 = vmatprep.subr.bf16.mxu1 %v2869_v48  ;;  %641 = vmatprep.mubr.f32.mxu0 %v2731_v1 }
  0x45   :  { %712 = vmatprep.mubr.f32.mxu1 %v2731_v1 }
  0x46   :  { %2084 = vmatpush1.bf16.msra.mxu0 %v2873_v51 }
  0x47   :  { %2116 = vmatpush1.bf16.msra.mxu1 %v2877_v55  ;;  %2086 = vmatprep.subr.bf16.mxu0 %v2881_v58 }
  0x48   :  { %2118 = vmatprep.subr.bf16.mxu1 %v2885_v61 }
  0x4a   :  { %2088 = vmatpush1.bf16.msra.mxu0 %v2892_v2 }
  0x4b   :  { %2120 = vmatpush1.bf16.msra.mxu1 %v2896_v5  ;;  %2090 = vmatprep.subr.bf16.mxu0 %v2900_v8 }
  0x4c   :  { %2122 = vmatprep.subr.bf16.mxu1 %v2904_v11 }
  0x4e   :  { %2092 = vmatpush1.bf16.msra.mxu0 %v2911_v15 }
  0x4f   :  { %2124 = vmatpush1.bf16.msra.mxu1 %v2915_v18  ;;  %2094 = vmatprep.subr.bf16.mxu0 %v2919_v21 }
  0x50   :  { %2126 = vmatprep.subr.bf16.mxu1 %v2923_v24 }
  0x52   :  { %2096 = vmatpush1.bf16.msra.mxu0 %v2930_v28 }
  0x53   :  { %2128 = vmatpush1.bf16.msra.mxu1 %v2934_v33  ;;  %2098 = vmatprep.subr.bf16.mxu0 %v2938_v37 }
  0x54   :  { %2130 = vmatprep.subr.bf16.mxu1 %v2942_v41 }
  0x56   :  { %2100 = vmatpush1.bf16.msra.mxu0 %v2949_v46 }
  0x57   :  { %2132 = vmatpush1.bf16.msra.mxu1 %v2953_v50  ;;  %2102 = vmatprep.subr.bf16.mxu0 %v2957_v54 }
  0x58   :  { %2134 = vmatprep.subr.bf16.mxu1 %v2961_v59 }
  0x5a   :  { %2104 = vmatpush1.bf16.msra.mxu0 %v2968_v0 }
  0x5b   :  { %2136 = vmatpush1.bf16.msra.mxu1 %v2972_v6  ;;  %2106 = vmatprep.subr.bf16.mxu0 %v2976_v10 }
  0x5c   :  { %2138 = vmatprep.subr.bf16.mxu1 %v2980_v14 }
  0x5e   :  { %2108 = vmatpush1.bf16.msra.mxu0 %v2987_v17 }
  0x5f   :  { %2140 = vmatpush1.bf16.msra.mxu1 %v2991_v19  ;;  %2142 = vmatprep.subr.bf16.mxu0 %v2850_v30 }
  0x60   :  { %2174 = vmatprep.subr.bf16.mxu1 %v2852_v31 }
 0x114   :  { %v479_v34 = vpop.f32.mrb[0].mxu0 }
 0x115   :  { %v2553_v35 = vadd.f32 %v479_v34, %v3043_v27  ;;  %v550_v38 = vpop.f32.mrb[0].mxu1  ;;  %v481_v40 = vpop.f32.mrb[1].mxu0 }
 0x116   :  { %v2554_v45 = vadd.f32 %v481_v40, %v3045_v32  ;;  %v552_v47 = vpop.f32.mrb[1].mxu1  ;;  %v2569_v57 = vadd.f32 %v550_v38, %v3052_v56 }
 0x117   :  { %v559_v49 = vmul.f32 0.5, %v2553_v35  ;;  %v2570_v53 = vadd.f32 %v552_v47, %v3048_v42 }
 0x118   :  { %v560_v52 = vmul.f32 0.5, %v2554_v45  ;;  %v561_v62 = vmul.f32 0.5, %v2569_v57 }
 0x119   :  { %2624 = vtanh.f32 %v559_v49 }
 0x11a   :  { %2626 = vtanh.f32 %v560_v52 }
 0x11b   :  { %2628 = vtanh.f32 %v2570_v53 }
 0x11c   :  { %2630 = vtanh.f32 %v561_v62 }
 0x123   :  { %v2625_v63 = vpop.eup %2624 }
 0x124   :  { %v565_v3 = vmul.f32 0.5, %v2625_v63  ;;  %v2627_v4 = vpop.eup %2626 }
 0x125   :  { %v566_v9 = vmul.f32 0.5, %v2627_v4  ;;  %v2629_v12 = vpop.eup %2628 }
 0x126   :  { %v568_v7 = vadd.f32 0.5, %v565_v3  ;;  %v2631_v26 = vpop.eup %2630 }
 0x127   :  { %v569_v16 = vadd.f32 0.5, %v566_v9  ;;  %v567_v20 = vmul.f32 0.5, %v2631_v26 }
 0x128   :  { %v573_v22 = vmul.f32 %v2629_v12, %v568_v7 }
 0x129   :  { %v572_v23 = vmul.f32 %v569_v16, %v348_v13  ;;  %v570_v29 = vadd.f32 0.5, %v567_v20 }
 0x12b   :  { %v3056_v25 = vadd.f32 %v573_v22, %v572_v23 }
 0x12d   :  { %2632 = vtanh.f32 %v3056_v25 }
 0x137   :  { %v2633_v34 = vpop.eup %2632 }
 0x138   :  { %v576_v35 = vmul.f32 %v2633_v34, %v570_v29 }
 0x13a   :  { %642 = vmatmul.mubr.f32.vlgmr.msra.gmra.mrb[2].mxu0 %v576_v35  ;;  %713 = vmatmul.mubr.f32.vlgmr.msra.gmra.mrb[2].mxu1 %v576_v35 }
 0x13b   :  { %2144 = vmatpush1.bf16.msra.mxu0 %v2857_v36  ;;  %2176 = vmatpush1.bf16.msra.mxu1 %v2860_v39 }
 0x13c   :  { %2146 = vmatprep.subr.bf16.mxu0 %v2863_v43  ;;  %2178 = vmatprep.subr.bf16.mxu1 %v2869_v48 }
 0x13d   :  { %805 = vmatprep.mubr.f32.mxu0 %v2731_v1  ;;  %876 = vmatprep.mubr.f32.mxu1 %v2731_v1 }
 0x13f   :  { %2148 = vmatpush1.bf16.msra.mxu0 %v2873_v51  ;;  %2180 = vmatpush1.bf16.msra.mxu1 %v2877_v55 }
 0x140   :  { %2150 = vmatprep.subr.bf16.mxu0 %v2881_v58  ;;  %2182 = vmatprep.subr.bf16.mxu1 %v2885_v61 }
 0x143   :  { %2152 = vmatpush1.bf16.msra.mxu0 %v2892_v2  ;;  %2184 = vmatpush1.bf16.msra.mxu1 %v2896_v5 }
 0x144   :  { %2154 = vmatprep.subr.bf16.mxu0 %v2900_v8  ;;  %2186 = vmatprep.subr.bf16.mxu1 %v2904_v11 }
 0x147   :  { %2156 = vmatpush1.bf16.msra.mxu0 %v2911_v15  ;;  %2188 = vmatpush1.bf16.msra.mxu1 %v2915_v18 }
 0x148   :  { %2158 = vmatprep.subr.bf16.mxu0 %v2919_v21  ;;  %2190 = vmatprep.subr.bf16.mxu1 %v2923_v24 }
 0x14b   :  { %2160 = vmatpush1.bf16.msra.mxu0 %v2930_v28  ;;  %2192 = vmatpush1.bf16.msra.mxu1 %v2934_v33 }
 0x14c   :  { %2162 = vmatprep.subr.bf16.mxu0 %v2938_v37  ;;  %2194 = vmatprep.subr.bf16.mxu1 %v2942_v41 }
 0x14f   :  { %2164 = vmatpush1.bf16.msra.mxu0 %v2949_v46  ;;  %2196 = vmatpush1.bf16.msra.mxu1 %v2953_v50 }
 0x150   :  { %2166 = vmatprep.subr.bf16.mxu0 %v2957_v54  ;;  %2198 = vmatprep.subr.bf16.mxu1 %v2961_v59 }
 0x153   :  { %2168 = vmatpush1.bf16.msra.mxu0 %v2968_v0  ;;  %2200 = vmatpush1.bf16.msra.mxu1 %v2972_v6 }
 0x154   :  { %2170 = vmatprep.subr.bf16.mxu0 %v2976_v10  ;;  %2202 = vmatprep.subr.bf16.mxu1 %v2980_v14 }
 0x157   :  { %2172 = vmatpush1.bf16.msra.mxu0 %v2987_v17  ;;  %2204 = vmatpush1.bf16.msra.mxu1 %v2991_v19 }
 0x158   :  { %2206 = vmatprep.subr.bf16.mxu0 %v2850_v30  ;;  %2238 = vmatprep.subr.bf16.mxu1 %v2852_v31 }
 0x20d   :  { %v643_v38 = vpop.f32.mrb[2].mxu0  ;;  %v714_v40 = vpop.f32.mrb[2].mxu1 }
 0x20e   :  { %v2555_v44 = vadd.f32 %v643_v38, %v3043_v27  ;;  %v645_v45 = vpop.f32.mrb[3].mxu0  ;;  %v716_v47 = vpop.f32.mrb[3].mxu1  ;;  %v2571_v60 = vadd.f32 %v714_v40, %v3052_v56 }
 0x20f   :  { %v2556_v49 = vadd.f32 %v645_v45, %v3045_v32  ;;  %v2572_v57 = vadd.f32 %v716_v47, %v3048_v42 }
 0x210   :  { %v723_v52 = vmul.f32 0.5, %v2555_v44  ;;  %v725_v62 = vmul.f32 0.5, %v2571_v60 }
 0x211   :  { %v724_v53 = vmul.f32 0.5, %v2556_v49 }
 0x212   :  { %2634 = vtanh.f32 %v723_v52 }
 0x213   :  { %2636 = vtanh.f32 %v724_v53 }
 0x214   :  { %2638 = vtanh.f32 %v2572_v57 }
 0x215   :  { %2640 = vtanh.f32 %v725_v62 }
 0x21c   :  { %v2635_v63 = vpop.eup %2634 }
 0x21d   :  { %v729_v3 = vmul.f32 0.5, %v2635_v63  ;;  %v2637_v4 = vpop.eup %2636 }
 0x21e   :  { %v730_v9 = vmul.f32 0.5, %v2637_v4  ;;  %v2639_v12 = vpop.eup %2638 }
 0x21f   :  { %v732_v7 = vadd.f32 0.5, %v729_v3  ;;  %v2641_v26 = vpop.eup %2640 }
 0x220   :  { %v733_v13 = vadd.f32 0.5, %v730_v9  ;;  %v731_v20 = vmul.f32 0.5, %v2641_v26 }
 0x221   :  { %v737_v16 = vmul.f32 %v2639_v12, %v732_v7 }
 0x222   :  { %v736_v22 = vmul.f32 %v733_v13, %v3056_v25  ;;  %v734_v29 = vadd.f32 0.5, %v731_v20 }
 0x224   :  { %v3098_v23 = vadd.f32 %v737_v16, %v736_v22 }
 0x226   :  { %2642 = vtanh.f32 %v3098_v23 }
 0x230   :  { %v2643_v34 = vpop.eup %2642 }
 0x231   :  { %v740_v35 = vmul.f32 %v2643_v34, %v734_v29 }
 0x233   :  { %806 = vmatmul.mubr.f32.vlgmr.msra.gmra.mrb[4].mxu0 %v740_v35  ;;  %877 = vmatmul.mubr.f32.vlgmr.msra.gmra.mrb[4].mxu1 %v740_v35 }
 0x234   :  { %2208 = vmatpush1.bf16.msra.mxu0 %v2857_v36  ;;  %2240 = vmatpush1.bf16.msra.mxu1 %v2860_v39 }
 0x235   :  { %2210 = vmatprep.subr.bf16.mxu0 %v2863_v43  ;;  %2242 = vmatprep.subr.bf16.mxu1 %v2869_v48 }
 0x236   :  { %969 = vmatprep.mubr.f32.mxu0 %v2731_v1  ;;  %1040 = vmatprep.mubr.f32.mxu1 %v2731_v1 }
 0x238   :  { %2212 = vmatpush1.bf16.msra.mxu0 %v2873_v51  ;;  %2244 = vmatpush1.bf16.msra.mxu1 %v2877_v55 }
 0x239   :  { %2214 = vmatprep.subr.bf16.mxu0 %v2881_v58  ;;  %2246 = vmatprep.subr.bf16.mxu1 %v2885_v61 }
 0x23c   :  { %2216 = vmatpush1.bf16.msra.mxu0 %v2892_v2  ;;  %2248 = vmatpush1.bf16.msra.mxu1 %v2896_v5 }
 0x23d   :  { %2218 = vmatprep.subr.bf16.mxu0 %v2900_v8  ;;  %2250 = vmatprep.subr.bf16.mxu1 %v2904_v11 }
 0x240   :  { %2220 = vmatpush1.bf16.msra.mxu0 %v2911_v15  ;;  %2252 = vmatpush1.bf16.msra.mxu1 %v2915_v18 }
 0x241   :  { %2222 = vmatprep.subr.bf16.mxu0 %v2919_v21  ;;  %2254 = vmatprep.subr.bf16.mxu1 %v2923_v24 }
 0x244   :  { %2224 = vmatpush1.bf16.msra.mxu0 %v2930_v28  ;;  %2256 = vmatpush1.bf16.msra.mxu1 %v2934_v33 }
 0x245   :  { %2226 = vmatprep.subr.bf16.mxu0 %v2938_v37  ;;  %2258 = vmatprep.subr.bf16.mxu1 %v2942_v41 }
 0x248   :  { %2228 = vmatpush1.bf16.msra.mxu0 %v2949_v46  ;;  %2260 = vmatpush1.bf16.msra.mxu1 %v2953_v50 }
 0x249   :  { %2230 = vmatprep.subr.bf16.mxu0 %v2957_v54  ;;  %2262 = vmatprep.subr.bf16.mxu1 %v2961_v59 }
 0x24c   :  { %2232 = vmatpush1.bf16.msra.mxu0 %v2968_v0  ;;  %2264 = vmatpush1.bf16.msra.mxu1 %v2972_v6 }
 0x24d   :  { %2234 = vmatprep.subr.bf16.mxu0 %v2976_v10  ;;  %2266 = vmatprep.subr.bf16.mxu1 %v2980_v14 }
 0x250   :  { %2236 = vmatpush1.bf16.msra.mxu0 %v2987_v17  ;;  %2268 = vmatpush1.bf16.msra.mxu1 %v2991_v19 }
 0x251   :  { %2270 = vmatprep.subr.bf16.mxu0 %v2850_v30  ;;  %2302 = vmatprep.subr.bf16.mxu1 %v2852_v31 }
 0x306   :  { %v807_v25 = vpop.f32.mrb[4].mxu0  ;;  %v878_v38 = vpop.f32.mrb[4].mxu1 }
 0x307   :  { %v2557_v40 = vadd.f32 %v807_v25, %v3043_v27  ;;  %v809_v44 = vpop.f32.mrb[5].mxu0  ;;  %v880_v45 = vpop.f32.mrb[5].mxu1  ;;  %v2573_v57 = vadd.f32 %v878_v38, %v3052_v56 }
 0x308   :  { %v2558_v47 = vadd.f32 %v809_v44, %v3045_v32  ;;  %v2574_v53 = vadd.f32 %v880_v45, %v3048_v42 }
 0x309   :  { %v887_v49 = vmul.f32 0.5, %v2557_v40  ;;  %v889_v60 = vmul.f32 0.5, %v2573_v57 }
 0x30a   :  { %v888_v52 = vmul.f32 0.5, %v2558_v47 }
 0x30b   :  { %2644 = vtanh.f32 %v887_v49 }
 0x30c   :  { %2646 = vtanh.f32 %v888_v52 }
 0x30d   :  { %2648 = vtanh.f32 %v2574_v53 }
 0x30e   :  { %2650 = vtanh.f32 %v889_v60 }
 0x315   :  { %v2645_v62 = vpop.eup %2644 }
 0x316   :  { %v893_v63 = vmul.f32 0.5, %v2645_v62  ;;  %v2647_v3 = vpop.eup %2646 }
 0x317   :  { %v894_v7 = vmul.f32 0.5, %v2647_v3  ;;  %v2649_v9 = vpop.eup %2648 }
 0x318   :  { %v896_v4 = vadd.f32 0.5, %v893_v63  ;;  %v2651_v26 = vpop.eup %2650 }
 0x319   :  { %v897_v12 = vadd.f32 0.5, %v894_v7  ;;  %v895_v20 = vmul.f32 0.5, %v2651_v26 }
 0x31a   :  { %v901_v13 = vmul.f32 %v2649_v9, %v896_v4 }
 0x31b   :  { %v900_v16 = vmul.f32 %v897_v12, %v3098_v23  ;;  %v898_v29 = vadd.f32 0.5, %v895_v20 }
 0x31d   :  { %v3140_v22 = vadd.f32 %v901_v13, %v900_v16 }
 0x31f   :  { %2652 = vtanh.f32 %v3140_v22 }
 0x329   :  { %v2653_v34 = vpop.eup %2652 }
 0x32a   :  { %v904_v35 = vmul.f32 %v2653_v34, %v898_v29 }
 0x32c   :  { %970 = vmatmul.mubr.f32.vlgmr.msra.gmra.mrb[6].mxu0 %v904_v35  ;;  %1041 = vmatmul.mubr.f32.vlgmr.msra.gmra.mrb[6].mxu1 %v904_v35 }
 0x32d   :  { %2272 = vmatpush1.bf16.msra.mxu0 %v2857_v36  ;;  %2304 = vmatpush1.bf16.msra.mxu1 %v2860_v39 }
 0x32e   :  { %2274 = vmatprep.subr.bf16.mxu0 %v2863_v43  ;;  %2306 = vmatprep.subr.bf16.mxu1 %v2869_v48 }
 0x32f   :  { %1133 = vmatprep.mubr.f32.mxu0 %v2731_v1  ;;  %1204 = vmatprep.mubr.f32.mxu1 %v2731_v1 }
 0x331   :  { %2276 = vmatpush1.bf16.msra.mxu0 %v2873_v51  ;;  %2308 = vmatpush1.bf16.msra.mxu1 %v2877_v55 }
 0x332   :  { %2278 = vmatprep.subr.bf16.mxu0 %v2881_v58  ;;  %2310 = vmatprep.subr.bf16.mxu1 %v2885_v61 }
 0x335   :  { %2280 = vmatpush1.bf16.msra.mxu0 %v2892_v2  ;;  %2312 = vmatpush1.bf16.msra.mxu1 %v2896_v5 }
 0x336   :  { %2282 = vmatprep.subr.bf16.mxu0 %v2900_v8  ;;  %2314 = vmatprep.subr.bf16.mxu1 %v2904_v11 }
 0x339   :  { %2284 = vmatpush1.bf16.msra.mxu0 %v2911_v15  ;;  %2316 = vmatpush1.bf16.msra.mxu1 %v2915_v18 }
 0x33a   :  { %2286 = vmatprep.subr.bf16.mxu0 %v2919_v21  ;;  %2318 = vmatprep.subr.bf16.mxu1 %v2923_v24 }
 0x33d   :  { %2288 = vmatpush1.bf16.msra.mxu0 %v2930_v28  ;;  %2320 = vmatpush1.bf16.msra.mxu1 %v2934_v33 }
 0x33e   :  { %2290 = vmatprep.subr.bf16.mxu0 %v2938_v37  ;;  %2322 = vmatprep.subr.bf16.mxu1 %v2942_v41 }
 0x341   :  { %2292 = vmatpush1.bf16.msra.mxu0 %v2949_v46  ;;  %2324 = vmatpush1.bf16.msra.mxu1 %v2953_v50 }
 0x342   :  { %2294 = vmatprep.subr.bf16.mxu0 %v2957_v54  ;;  %2326 = vmatprep.subr.bf16.mxu1 %v2961_v59 }
 0x345   :  { %2296 = vmatpush1.bf16.msra.mxu0 %v2968_v0  ;;  %2328 = vmatpush1.bf16.msra.mxu1 %v2972_v6 }
 0x346   :  { %2298 = vmatprep.subr.bf16.mxu0 %v2976_v10  ;;  %2330 = vmatprep.subr.bf16.mxu1 %v2980_v14 }
 0x349   :  { %2300 = vmatpush1.bf16.msra.mxu0 %v2987_v17  ;;  %2332 = vmatpush1.bf16.msra.mxu1 %v2991_v19 }
 0x34a   :  { %2334 = vmatprep.subr.bf16.mxu0 %v2850_v30  ;;  %2366 = vmatprep.subr.bf16.mxu1 %v2852_v31 }
 0x3ff   :  { %v971_v23 = vpop.f32.mrb[6].mxu0  ;;  %v1042_v25 = vpop.f32.mrb[6].mxu1 }
 0x400   :  { %v2559_v38 = vadd.f32 %v971_v23, %v3043_v27  ;;  %v973_v40 = vpop.f32.mrb[7].mxu0  ;;  %v1044_v44 = vpop.f32.mrb[7].mxu1  ;;  %v2575_v53 = vadd.f32 %v1042_v25, %v3052_v56 }
 0x401   :  { %v2560_v45 = vadd.f32 %v973_v40, %v3045_v32  ;;  %v2576_v52 = vadd.f32 %v1044_v44, %v3048_v42 }
 0x402   :  { %v1051_v47 = vmul.f32 0.5, %v2559_v38  ;;  %v1053_v57 = vmul.f32 0.5, %v2575_v53 }
 0x403   :  { %v1052_v49 = vmul.f32 0.5, %v2560_v45 }
 0x404   :  { %2654 = vtanh.f32 %v1051_v47 }
 0x405   :  { %2656 = vtanh.f32 %v1052_v49 }
 0x406   :  { %2658 = vtanh.f32 %v2576_v52 }
 0x407   :  { %2660 = vtanh.f32 %v1053_v57 }
 0x40e   :  { %v2655_v60 = vpop.eup %2654 }
 0x40f   :  { %v1057_v62 = vmul.f32 0.5, %v2655_v60  ;;  %v2657_v63 = vpop.eup %2656 }
 0x410   :  { %v1058_v4 = vmul.f32 0.5, %v2657_v63  ;;  %v2659_v7 = vpop.eup %2658 }
 0x411   :  { %v1060_v3 = vadd.f32 0.5, %v1057_v62  ;;  %v2661_v26 = vpop.eup %2660 }
 0x412   :  { %v1061_v9 = vadd.f32 0.5, %v1058_v4  ;;  %v1059_v20 = vmul.f32 0.5, %v2661_v26 }
 0x413   :  { %v1065_v12 = vmul.f32 %v2659_v7, %v1060_v3 }
 0x414   :  { %v1064_v13 = vmul.f32 %v1061_v9, %v3140_v22  ;;  %v1062_v29 = vadd.f32 0.5, %v1059_v20 }
 0x416   :  { %v3182_v16 = vadd.f32 %v1065_v12, %v1064_v13 }
 0x418   :  { %2662 = vtanh.f32 %v3182_v16 }
 0x422   :  { %v2663_v34 = vpop.eup %2662 }
 0x423   :  { %v1068_v35 = vmul.f32 %v2663_v34, %v1062_v29 }
 0x425   :  { %1134 = vmatmul.mubr.f32.vlgmr.msra.gmra.mrb[8].mxu0 %v1068_v35  ;;  %1205 = vmatmul.mubr.f32.vlgmr.msra.gmra.mrb[8].mxu1 %v1068_v35 }
 0x426   :  { %2336 = vmatpush1.bf16.msra.mxu0 %v2857_v36  ;;  %2368 = vmatpush1.bf16.msra.mxu1 %v2860_v39 }
 0x427   :  { %2338 = vmatprep.subr.bf16.mxu0 %v2863_v43  ;;  %2370 = vmatprep.subr.bf16.mxu1 %v2869_v48 }
 0x428   :  { %1297 = vmatprep.mubr.f32.mxu0 %v2731_v1  ;;  %1368 = vmatprep.mubr.f32.mxu1 %v2731_v1 }
 0x42a   :  { %2340 = vmatpush1.bf16.msra.mxu0 %v2873_v51  ;;  %2372 = vmatpush1.bf16.msra.mxu1 %v2877_v55 }
 0x42b   :  { %2342 = vmatprep.subr.bf16.mxu0 %v2881_v58  ;;  %2374 = vmatprep.subr.bf16.mxu1 %v2885_v61 }
 0x42e   :  { %2344 = vmatpush1.bf16.msra.mxu0 %v2892_v2  ;;  %2376 = vmatpush1.bf16.msra.mxu1 %v2896_v5 }
 0x42f   :  { %2346 = vmatprep.subr.bf16.mxu0 %v2900_v8  ;;  %2378 = vmatprep.subr.bf16.mxu1 %v2904_v11 }
 0x432   :  { %2348 = vmatpush1.bf16.msra.mxu0 %v2911_v15  ;;  %2380 = vmatpush1.bf16.msra.mxu1 %v2915_v18 }
 0x433   :  { %2350 = vmatprep.subr.bf16.mxu0 %v2919_v21  ;;  %2382 = vmatprep.subr.bf16.mxu1 %v2923_v24 }
 0x436   :  { %2352 = vmatpush1.bf16.msra.mxu0 %v2930_v28  ;;  %2384 = vmatpush1.bf16.msra.mxu1 %v2934_v33 }
 0x437   :  { %2354 = vmatprep.subr.bf16.mxu0 %v2938_v37  ;;  %2386 = vmatprep.subr.bf16.mxu1 %v2942_v41 }
 0x43a   :  { %2356 = vmatpush1.bf16.msra.mxu0 %v2949_v46  ;;  %2388 = vmatpush1.bf16.msra.mxu1 %v2953_v50 }
 0x43b   :  { %2358 = vmatprep.subr.bf16.mxu0 %v2957_v54  ;;  %2390 = vmatprep.subr.bf16.mxu1 %v2961_v59 }
 0x43e   :  { %2360 = vmatpush1.bf16.msra.mxu0 %v2968_v0  ;;  %2392 = vmatpush1.bf16.msra.mxu1 %v2972_v6 }
 0x43f   :  { %2362 = vmatprep.subr.bf16.mxu0 %v2976_v10  ;;  %2394 = vmatprep.subr.bf16.mxu1 %v2980_v14 }
 0x442   :  { %2364 = vmatpush1.bf16.msra.mxu0 %v2987_v17  ;;  %2396 = vmatpush1.bf16.msra.mxu1 %v2991_v19 }
 0x443   :  { %2398 = vmatprep.subr.bf16.mxu0 %v2850_v30  ;;  %2430 = vmatprep.subr.bf16.mxu1 %v2852_v31 }
 0x4f8   :  { %v1135_v22 = vpop.f32.mrb[8].mxu0  ;;  %v1206_v23 = vpop.f32.mrb[8].mxu1 }
 0x4f9   :  { %v2561_v25 = vadd.f32 %v1135_v22, %v3043_v27  ;;  %v1137_v38 = vpop.f32.mrb[9].mxu0  ;;  %v1208_v40 = vpop.f32.mrb[9].mxu1  ;;  %v2577_v52 = vadd.f32 %v1206_v23, %v3052_v56 }
 0x4fa   :  { %v2562_v44 = vadd.f32 %v1137_v38, %v3045_v32  ;;  %v2578_v49 = vadd.f32 %v1208_v40, %v3048_v42 }
 0x4fb   :  { %v1215_v45 = vmul.f32 0.5, %v2561_v25  ;;  %v1217_v53 = vmul.f32 0.5, %v2577_v52 }
 0x4fc   :  { %v1216_v47 = vmul.f32 0.5, %v2562_v44 }
 0x4fd   :  { %2664 = vtanh.f32 %v1215_v45 }
 0x4fe   :  { %2666 = vtanh.f32 %v1216_v47 }
 0x4ff   :  { %2668 = vtanh.f32 %v2578_v49 }
 0x500   :  { %2670 = vtanh.f32 %v1217_v53 }
 0x507   :  { %v2665_v57 = vpop.eup %2664 }
 0x508   :  { %v1221_v60 = vmul.f32 0.5, %v2665_v57  ;;  %v2667_v62 = vpop.eup %2666 }
 0x509   :  { %v1222_v3 = vmul.f32 0.5, %v2667_v62  ;;  %v2669_v4 = vpop.eup %2668 }
 0x50a   :  { %v1224_v63 = vadd.f32 0.5, %v1221_v60  ;;  %v2671_v26 = vpop.eup %2670 }
 0x50b   :  { %v1225_v7 = vadd.f32 0.5, %v1222_v3  ;;  %v1223_v20 = vmul.f32 0.5, %v2671_v26 }
 0x50c   :  { %v1229_v9 = vmul.f32 %v2669_v4, %v1224_v63 }
 0x50d   :  { %v1228_v12 = vmul.f32 %v1225_v7, %v3182_v16  ;;  %v1226_v29 = vadd.f32 0.5, %v1223_v20 }
 0x50f   :  { %v3224_v13 = vadd.f32 %v1229_v9, %v1228_v12 }
 0x511   :  { %2672 = vtanh.f32 %v3224_v13 }
 0x51b   :  { %v2673_v34 = vpop.eup %2672 }
 0x51c   :  { %v1232_v35 = vmul.f32 %v2673_v34, %v1226_v29  ;;  %v1728_v34 = vld [vmem:[%s3384_s5 + $0x18] sm:$0xff] }
 0x51e   :  { %1298 = vmatmul.mubr.f32.vlgmr.msra.gmra.mrb[10].mxu0 %v1232_v35  ;;  %1369 = vmatmul.mubr.f32.vlgmr.msra.gmra.mrb[10].mxu1 %v1232_v35 }
 0x51f   :  { %2400 = vmatpush1.bf16.msra.mxu0 %v2857_v36  ;;  %2432 = vmatpush1.bf16.msra.mxu1 %v2860_v39 }
 0x520   :  { %2402 = vmatprep.subr.bf16.mxu0 %v2863_v43  ;;  %2434 = vmatprep.subr.bf16.mxu1 %v2869_v48 }
 0x521   :  { %1461 = vmatprep.mubr.f32.mxu0 %v2731_v1  ;;  %1532 = vmatprep.mubr.f32.mxu1 %v2731_v1 }
 0x523   :  { %2404 = vmatpush1.bf16.msra.mxu0 %v2873_v51  ;;  %2436 = vmatpush1.bf16.msra.mxu1 %v2877_v55 }
 0x524   :  { %2406 = vmatprep.subr.bf16.mxu0 %v2881_v58  ;;  %2438 = vmatprep.subr.bf16.mxu1 %v2885_v61 }
 0x527   :  { %2408 = vmatpush1.bf16.msra.mxu0 %v2892_v2  ;;  %2440 = vmatpush1.bf16.msra.mxu1 %v2896_v5 }
 0x528   :  { %2410 = vmatprep.subr.bf16.mxu0 %v2900_v8  ;;  %2442 = vmatprep.subr.bf16.mxu1 %v2904_v11 }
 0x52b   :  { %2412 = vmatpush1.bf16.msra.mxu0 %v2911_v15  ;;  %2444 = vmatpush1.bf16.msra.mxu1 %v2915_v18 }
 0x52c   :  { %2414 = vmatprep.subr.bf16.mxu0 %v2919_v21  ;;  %2446 = vmatprep.subr.bf16.mxu1 %v2923_v24 }
 0x52f   :  { %2416 = vmatpush1.bf16.msra.mxu0 %v2930_v28  ;;  %2448 = vmatpush1.bf16.msra.mxu1 %v2934_v33 }
 0x530   :  { %2418 = vmatprep.subr.bf16.mxu0 %v2938_v37  ;;  %2450 = vmatprep.subr.bf16.mxu1 %v2942_v41 }
 0x533   :  { %2420 = vmatpush1.bf16.msra.mxu0 %v2949_v46  ;;  %2452 = vmatpush1.bf16.msra.mxu1 %v2953_v50 }
 0x534   :  { %2422 = vmatprep.subr.bf16.mxu0 %v2957_v54  ;;  %2454 = vmatprep.subr.bf16.mxu1 %v2961_v59 }
 0x537   :  { %2424 = vmatpush1.bf16.msra.mxu0 %v2968_v0  ;;  %2456 = vmatpush1.bf16.msra.mxu1 %v2972_v6 }
 0x538   :  { %2426 = vmatprep.subr.bf16.mxu0 %v2976_v10  ;;  %2458 = vmatprep.subr.bf16.mxu1 %v2980_v14 }
 0x53b   :  { %2428 = vmatpush1.bf16.msra.mxu0 %v2987_v17  ;;  %2460 = vmatpush1.bf16.msra.mxu1 %v2991_v19 }
 0x53c   :  { %2462 = vmatprep.subr.bf16.mxu0 %v2850_v30  ;;  %2494 = vmatprep.subr.bf16.mxu1 %v2852_v31 }
 0x5f1   :  { %v1299_v16 = vpop.f32.mrb[10].mxu0  ;;  %v1370_v22 = vpop.f32.mrb[10].mxu1 }
 0x5f2   :  { %v2563_v23 = vadd.f32 %v1299_v16, %v3043_v27  ;;  %v1301_v25 = vpop.f32.mrb[11].mxu0  ;;  %v1372_v38 = vpop.f32.mrb[11].mxu1  ;;  %v2579_v49 = vadd.f32 %v1370_v22, %v3052_v56  ;;  %v1729_v16 = vld [vmem:[%s3384_s5 + $0x20] sm:$0xff]  ;;  %v1730_v22 = vld [vmem:[%s3384_s5 + $0x28] sm:$0xff] }
 0x5f3   :  { %v2564_v40 = vadd.f32 %v1301_v25, %v3045_v32  ;;  %v2580_v47 = vadd.f32 %v1372_v38, %v3048_v42  ;;  %v1731_v25 = vld [vmem:[%s3384_s5 + $0x30] sm:$0xff]  ;;  %v1732_v38 = vld [vmem:[%s3384_s5 + $0x38] sm:$0xff] }
 0x5f4   :  { %v1379_v44 = vmul.f32 0.5, %v2563_v23  ;;  %v1381_v30 = vmul.f32 0.5, %v2579_v49  ;;  %v2532_v23 = vpack.c.bf16 %v1730_v22, %v1729_v16  ;;  %v1735_v49 = vld [vmem:[%s3384_s5 + $0x50] sm:$0xff] }
 0x5f5   :  { %v1380_v45 = vmul.f32 0.5, %v2564_v40  ;;  %v2535_v40 = vpack.c.bf16 %v1732_v38, %v1731_v25 }
 0x5f6   :  { %2674 = vtanh.f32 %v1379_v44  ;;  %v1733_v44 = vld [vmem:[%s3384_s5 + $0x40] sm:$0xff] }
 0x5f7   :  { %2676 = vtanh.f32 %v1380_v45  ;;  %v1734_v45 = vld [vmem:[%s3384_s5 + $0x48] sm:$0xff] }
 0x5f8   :  { %2678 = vtanh.f32 %v2580_v47  ;;  %v2538_v47 = vpack.c.bf16 %v1734_v45, %v1733_v44 }
 0x5f9   :  { %2680 = vtanh.f32 %v1381_v30  ;;  %v1736_v30 = vld [vmem:[%s3384_s5 + $0x58] sm:$0xff] }
 0x600   :  { %v2675_v52 = vpop.eup %2674 }
 0x601   :  { %v1385_v31 = vmul.f32 0.5, %v2675_v52  ;;  %v2677_v53 = vpop.eup %2676  ;;  %v2541_v52 = vpack.c.bf16 %v1736_v30, %v1735_v49 }
 0x602   :  { %v1386_v60 = vmul.f32 0.5, %v2677_v53  ;;  %v2679_v62 = vpop.eup %2678  ;;  %v1738_v53 = vld [vmem:[%s3384_s5 + $0x68] sm:$0xff] }
 0x603   :  { %v1388_v57 = vadd.f32 0.5, %v1385_v31  ;;  %v2681_v9 = vpop.eup %2680  ;;  %v1737_v31 = vld [vmem:[%s3384_s5 + $0x60] sm:$0xff] }
 0x604   :  { %v1389_v63 = vadd.f32 0.5, %v1386_v60  ;;  %v1387_v12 = vmul.f32 0.5, %v2681_v9  ;;  %v1739_v60 = vld [vmem:[%s3384_s5 + $0x70] sm:$0xff] }
 0x605   :  { %v1393_v3 = vmul.f32 %v2679_v62, %v1388_v57  ;;  %v2544_v57 = vpack.c.bf16 %v1738_v53, %v1737_v31  ;;  %v1740_v62 = vld [vmem:[%s3384_s5 + $0x78] sm:$0xff] }
 0x606   :  { %v1392_v4 = vmul.f32 %v1389_v63, %v3224_v13  ;;  %v1390_v26 = vadd.f32 0.5, %v1387_v12  ;;  %v1727_v13 = vld [vmem:[%s3384_s5 + $0x10] sm:$0xff]  ;;  %v2547_v63 = vpack.c.bf16 %v1740_v62, %v1739_v60 }
 0x607   :  { %v2529_v35 = vpack.c.bf16 %v1728_v34, %v1727_v13 }
 0x608   :  { %v3266_v7 = vadd.f32 %v1393_v3, %v1392_v4 }
 0x60a   :  { %2682 = vtanh.f32 %v3266_v7 }
 0x614   :  { %v2683_v20 = vpop.eup %2682 }
 0x615   :  { %v1396_v29 = vmul.f32 %v2683_v20, %v1390_v26 }
 0x617   :  { %1462 = vmatmul.mubr.f32.vlgmr.msra.gmra.mrb[12].mxu0 %v1396_v29  ;;  %1533 = vmatmul.mubr.f32.vlgmr.msra.gmra.mrb[12].mxu1 %v1396_v29 }
 0x618   :  { %2464 = vmatpush1.bf16.msra.mxu0 %v2857_v36  ;;  %2496 = vmatpush1.bf16.msra.mxu1 %v2860_v39 }
 0x619   :  { %2466 = vmatprep.subr.bf16.mxu0 %v2863_v43  ;;  %2498 = vmatprep.subr.bf16.mxu1 %v2869_v48 }
 0x61a   :  { %1625 = vmatprep.mubr.f32.mxu0 %v2731_v1  ;;  %1696 = vmatprep.mubr.f32.mxu1 %v2731_v1 }
 0x61c   :  { %2468 = vmatpush1.bf16.msra.mxu0 %v2873_v51  ;;  %2500 = vmatpush1.bf16.msra.mxu1 %v2877_v55 }
 0x61d   :  { %2470 = vmatprep.subr.bf16.mxu0 %v2881_v58  ;;  %2502 = vmatprep.subr.bf16.mxu1 %v2885_v61 }
 0x620   :  { %2472 = vmatpush1.bf16.msra.mxu0 %v2892_v2  ;;  %2504 = vmatpush1.bf16.msra.mxu1 %v2896_v5 }
 0x621   :  { %2474 = vmatprep.subr.bf16.mxu0 %v2900_v8  ;;  %2506 = vmatprep.subr.bf16.mxu1 %v2904_v11 }
 0x624   :  { %2476 = vmatpush1.bf16.msra.mxu0 %v2911_v15  ;;  %2508 = vmatpush1.bf16.msra.mxu1 %v2915_v18 }
 0x625   :  { %2478 = vmatprep.subr.bf16.mxu0 %v2919_v21  ;;  %2510 = vmatprep.subr.bf16.mxu1 %v2923_v24 }
 0x628   :  { %2480 = vmatpush1.bf16.msra.mxu0 %v2930_v28  ;;  %2512 = vmatpush1.bf16.msra.mxu1 %v2934_v33 }
 0x629   :  { %2482 = vmatprep.subr.bf16.mxu0 %v2938_v37  ;;  %2514 = vmatprep.subr.bf16.mxu1 %v2942_v41 }
 0x62c   :  { %2484 = vmatpush1.bf16.msra.mxu0 %v2949_v46  ;;  %2516 = vmatpush1.bf16.msra.mxu1 %v2953_v50 }
 0x62d   :  { %2486 = vmatprep.subr.bf16.mxu0 %v2957_v54  ;;  %2518 = vmatprep.subr.bf16.mxu1 %v2961_v59 }
 0x630   :  { %2488 = vmatpush1.bf16.msra.mxu0 %v2968_v0  ;;  %2520 = vmatpush1.bf16.msra.mxu1 %v2972_v6 }
 0x631   :  { %2490 = vmatprep.subr.bf16.mxu0 %v2976_v10  ;;  %2522 = vmatprep.subr.bf16.mxu1 %v2980_v14  ;;  %v1725_v10 = vld [vmem:[%s3384_s5] sm:$0xff]  ;;  %v1726_v14 = vld [vmem:[%s3384_s5 + $0x8] sm:$0xff] }
 0x634   :  { %2492 = vmatpush1.bf16.msra.mxu0 %v2987_v17  ;;  %2524 = vmatpush1.bf16.msra.mxu1 %v2991_v19  ;;  %v2526_v17 = vpack.c.bf16 %v1726_v14, %v1725_v10  ;;  %v2732_v19 = vmov 0.0|0.0  }
 0x635   :  { %2525 = vmatprep.subr.bf16.mxu0 %v2732_v19  ;;  %2549 = vmatprep.subr.bf16.mxu1 %v2732_v19 }
 0x6ea   :  { %v1463_v36 = vpop.f32.mrb[12].mxu0  ;;  %v1534_v39 = vpop.f32.mrb[12].mxu1 }
 0x6eb   :  { %v2565_v43 = vadd.f32 %v1463_v36, %v3043_v27  ;;  %v1465_v48 = vpop.f32.mrb[13].mxu0  ;;  %v1536_v51 = vpop.f32.mrb[13].mxu1  ;;  %v2581_v5 = vadd.f32 %v1534_v39, %v3052_v56 }
 0x6ec   :  { %v2566_v55 = vadd.f32 %v1465_v48, %v3045_v32  ;;  %v2582_v2 = vadd.f32 %v1536_v51, %v3048_v42 }
 0x6ed   :  { %v1543_v58 = vmul.f32 0.5, %v2565_v43  ;;  %v1545_v8 = vmul.f32 0.5, %v2581_v5 }
 0x6ee   :  { %v1544_v61 = vmul.f32 0.5, %v2566_v55 }
 0x6ef   :  { %2684 = vtanh.f32 %v1543_v58 }
 0x6f0   :  { %2686 = vtanh.f32 %v1544_v61 }
 0x6f1   :  { %2688 = vtanh.f32 %v2582_v2 }
 0x6f2   :  { %2690 = vtanh.f32 %v1545_v8 }
 0x6f9   :  { %v2685_v11 = vpop.eup %2684 }
 0x6fa   :  { %v1549_v15 = vmul.f32 0.5, %v2685_v11  ;;  %v2687_v18 = vpop.eup %2686 }
 0x6fb   :  { %v1550_v24 = vmul.f32 0.5, %v2687_v18  ;;  %v2689_v28 = vpop.eup %2688 }
 0x6fc   :  { %v1552_v21 = vadd.f32 0.5, %v1549_v15  ;;  %v2691_v50 = vpop.eup %2690 }
 0x6fd   :  { %v1553_v33 = vadd.f32 0.5, %v1550_v24  ;;  %v1551_v54 = vmul.f32 0.5, %v2691_v50  ;;  %v1932_v50 = vld [vmem:[#allocation2] ss:$0 sm:$0xff] }
 0x6fe   :  { %v1557_v37 = vmul.f32 %v2689_v28, %v1552_v21  ;;  %v1820_v21 = vld [vmem:[%s3386_s7 + $0x8] sm:$0x3]  ;;  %v1931_v28 = vld [vmem:[%s3385_s6] ss:$0 sm:$0xff] }
 0x6ff   :  { %v1556_v41 = vmul.f32 %v1553_v33, %v3266_v7  ;;  %v1554_v59 = vadd.f32 0.5, %v1551_v54 }
 0x701   :  { %v3306_v46 = vadd.f32 %v1557_v37, %v1556_v41 }
 0x703   :  { %2692 = vtanh.f32 %v3306_v46 }
 0x70d   :  { %v2693_v0 = vpop.eup %2692 }
 0x70e   :  { %v1560_v6 = vmul.f32 %v2693_v0, %v1554_v59  ;;  %v1906_v59 = vld [vmem:[%s3380_s1] sm:$0xff] }
 0x710   :  { %1626 = vmatmul.mubr.f32.vlgmr.msra.gmra.mrb[14].mxu0 %v1560_v6  ;;  %1697 = vmatmul.mubr.f32.vlgmr.msra.gmra.mrb[14].mxu1 %v1560_v6 }
 0x711   :  { %2527 = vmatpush3.bf16.msra.mxu0 %v2526_v17  ;;  %1987 = vmatprep.mubr.msk.f32.mxu0 %vm2733_vm2, %v2731_v1 }
 0x712   :  { %2528 = vmatprep.subr.bf16.mxu0 %v2732_v19  ;;  %1994 = vmatprep.mubr.msk.f32.mxu1 %vm2733_vm2, %v2731_v1 }
 0x715   :  { %2530 = vmatpush3.bf16.msra.mxu0 %v2529_v35 }
 0x716   :  { %2531 = vmatprep.subr.bf16.mxu0 %v2732_v19 }
 0x719   :  { %2533 = vmatpush3.bf16.msra.mxu0 %v2532_v23 }
 0x71a   :  { %2534 = vmatprep.subr.bf16.mxu0 %v2732_v19 }
 0x71d   :  { %2536 = vmatpush3.bf16.msra.mxu0 %v2535_v40 }
 0x71e   :  { %2537 = vmatprep.subr.bf16.mxu0 %v2732_v19 }
 0x721   :  { %2539 = vmatpush3.bf16.msra.mxu0 %v2538_v47 }
 0x722   :  { %2540 = vmatprep.subr.bf16.mxu0 %v2732_v19 }
 0x725   :  { %2542 = vmatpush3.bf16.msra.mxu0 %v2541_v52 }
 0x726   :  { %2543 = vmatprep.subr.bf16.mxu0 %v2732_v19 }
 0x729   :  { %2545 = vmatpush3.bf16.msra.mxu0 %v2544_v57 }
 0x72a   :  { %2546 = vmatprep.subr.bf16.mxu0 %v2732_v19 }
 0x72d   :  { %2548 = vmatpush3.bf16.msra.mxu0 %v2547_v63 }
 0x7e3   :  { %v1627_v3 = vpop.f32.mrb[14].mxu0  ;;  %v1698_v4 = vpop.f32.mrb[14].mxu1 }
 0x7e4   :  { %v2567_v7 = vadd.f32 %v1627_v3, %v3043_v27  ;;  %v1629_v1 = vpop.f32.mrb[15].mxu0  ;;  %v1700_v9 = vpop.f32.mrb[15].mxu1  ;;  %v2583_v36 = vadd.f32 %v1698_v4, %v3052_v56  ;;  %v1819_v56 = vld [vmem:[%s3386_s7] sm:$0xff] }
 0x7e5   :  { %v2568_v12 = vadd.f32 %v1629_v1, %v3045_v32  ;;  %v2584_v29 = vadd.f32 %v1700_v9, %v3048_v42  ;;  %v2550_v24 = vpack.c.bf16 %v1820_v21, %v1819_v56 }
 0x7e6   :  { %v1707_v26 = vmul.f32 0.5, %v2567_v7  ;;  %v1709_v39 = vmul.f32 0.5, %v2583_v36 }
 0x7e7   :  { %v1708_v20 = vmul.f32 0.5, %v2568_v12  ;;  %2552 = vmatpush3.bf16.msk.msra.mxu1 %vm2551_vm5, %v2550_v24 }
 0x7e8   :  { %2694 = vtanh.f32 %v1707_v26 }
 0x7e9   :  { %2696 = vtanh.f32 %v1708_v20 }
 0x7ea   :  { %2698 = vtanh.f32 %v2584_v29 }
 0x7eb   :  { %2700 = vtanh.f32 %v1709_v39 }
 0x7f2   :  { %v2695_v43 = vpop.eup %2694 }
 0x7f3   :  { %v1713_v48 = vmul.f32 0.5, %v2695_v43  ;;  %v2697_v51 = vpop.eup %2696 }
 0x7f4   :  { %v1714_v27 = vmul.f32 0.5, %v2697_v51  ;;  %v2699_v58 = vpop.eup %2698 }
 0x7f5   :  { %v1716_v55 = vadd.f32 0.5, %v1713_v48  ;;  %v2701_v8 = vpop.eup %2700 }
 0x7f6   :  { %v1717_v61 = vadd.f32 0.5, %v1714_v27  ;;  %v1715_v42 = vmul.f32 0.5, %v2701_v8 }
 0x7f7   :  { %v1721_v2 = vmul.f32 %v2699_v58, %v1716_v55 }
 0x7f8   :  { %v1720_v32 = vmul.f32 %v1717_v61, %v3306_v46  ;;  %v1718_v11 = vadd.f32 0.5, %v1715_v42 }
 0x7fa   :  { %v1722_v5 = vadd.f32 %v1721_v2, %v1720_v32 }
 0x7fc   :  { %2702 = vtanh.f32 %v1722_v5 }
 0x806   :  { %v2703_v15 = vpop.eup %2702 }
 0x807   :  { %v1724_v18 = vmul.f32 %v2703_v15, %v1718_v11 }
 0x809   :  { %1988 = vmatmul.mubr.f32.vlgmr.msra.gmra.mrb[16].mxu0 %v1724_v18 }
 0x8dc   :  { %v1814_v33 = vpop.f32.mrb[16].mxu0 }
 0x8dd   :  { %v1815_v37 = vadd.f32 %v1931_v28, %v1814_v33  ;;  %v1989_v41 = vpop.f32.mrb[17].mxu0 }
 0x8df   :  { %v1818_v46 = vmax.f32 %v1815_v37, 0.0 }
 0x8e1   :  { %1995 = vmatmul.mubr.msk.f32.vlgmr.msra.gmra.mrb[16].mxu1 %vm1828_vm6, %v1818_v46 }
 0x9b4   :  { %v1902_v54 = vpop.f32.mrb[16].mxu1 }
 0x9b5   :  { %v1903_v0 = vadd.f32 %v1932_v50, %v1902_v54  ;;  %v1996_v6 = vpop.f32.mrb[17].mxu1 }
 0x9b7   :  { %v1907_v10 = vadd.f32 %v1906_v59, %v1903_v0 }
 0x9b9   :  { %1909 = vst.msk [vmem:[%s3388_s9] sm:$0xff] %vm1908_vm7, %v1907_v10 }
 0x9ba   :  { %1914 = vsyncpa [#allocation4], 1 }

</bundles_post_ra>
